<compile_context>
chip_gen: v7x
topology: tpu7x:2x2x1
jax: 0.10.0
libtpu: 0.0.40
codegen_flags: <defaults>
</compile_context>

<pallas_src>
import functools
import math

import jax
import jax.numpy as jnp
from jax import lax
from jax.experimental import pallas as pl
from jax.experimental.pallas import tpu as pltpu


def self_attention_kernel(
        x_full_ref, x_q_ref,
        wq_ref, bq_ref, wk_ref, bk_ref, wv_ref, bv_ref,
        wo_ref, bo_ref, ln_w_ref, ln_b_ref,
        w1_ref, b1_ref, w2_ref, b2_ref,
        o_ref,
        k_sc, v_sc,
        *, num_heads, q_tile, kv_tile):
    """One transformer block (MHA + residual + LN + MLP + residual) for one
    (batch, query-tile) grid point. K/V work is hoisted to the first query-tile
    iteration of each batch element and kept in persistent VMEM scratch."""
    H = num_heads
    TQ = q_tile
    S = x_full_ref.shape[1]
    E = x_full_ref.shape[2]
    D = E // H
    scale = 1.0 / math.sqrt(D)
    cdt = k_sc.dtype                      # bf16 compute dtype for MXU operands

    # ---- K/V projection + head relayout: ONCE per batch element (t == 0) ----
    @pl.when(pl.program_id(1) == 0)
    def _():
        x_full = x_full_ref[0].astype(cdt)                              # (S, E)
        k = jnp.dot(x_full, wk_ref[...],
                    preferred_element_type=jnp.float32) + bk_ref[0]     # (S, E)
        v = jnp.dot(x_full, wv_ref[...],
                    preferred_element_type=jnp.float32) + bv_ref[0]     # (S, E)
        k_sc[...] = jnp.transpose(k.reshape(S, H, D), (1, 0, 2)).astype(cdt)
        v_sc[...] = jnp.transpose(v.reshape(S, H, D), (1, 0, 2)).astype(cdt)

    # ---- Q projection for this query tile only ----
    x_q = x_q_ref[0]                                                    # (TQ, E) f32
    q = jnp.dot(x_q.astype(cdt), wq_ref[...],
                preferred_element_type=jnp.float32) + bq_ref[0]         # (TQ, E) f32
    q = q * scale
    qh = jnp.transpose(q.reshape(TQ, H, D), (1, 0, 2)).astype(cdt)      # (H, TQ, D)

    # ---- batched multi-head attention ----
    if kv_tile >= S:
        # Single-shot softmax: scores comfortably fit in VMEM.
        s = jnp.einsum('hqd,hkd->hqk', qh, k_sc[...],
                       preferred_element_type=jnp.float32)              # (H,TQ,S) f32
        s = s - jnp.max(s, axis=-1, keepdims=True)
        p = jnp.exp(s)
        p = p * pl.reciprocal(jnp.sum(p, axis=-1, keepdims=True), approx=True)
        attn = jnp.einsum('hqk,hkd->hqd', p.astype(cdt), v_sc[...],
                          preferred_element_type=jnp.float32)           # (H,TQ,D) f32
    else:
        # Online-softmax (flash) over KV tiles: live score memory bounded at
        # (H, TQ, kv_tile) f32 regardless of S.
        n_kv = S // kv_tile

        def body(i, carry):
            m_i, l_i, acc = carry
            start = pl.multiple_of(i * kv_tile, kv_tile)
            k_blk = k_sc[:, pl.ds(start, kv_tile), :]                   # (H,TKV,D)
            v_blk = v_sc[:, pl.ds(start, kv_tile), :]
            s = jnp.einsum('hqd,hkd->hqk', qh, k_blk,
                           preferred_element_type=jnp.float32)          # (H,TQ,TKV)
            m_new = jnp.maximum(m_i, jnp.max(s, axis=-1, keepdims=True))
            alpha = jnp.exp(m_i - m_new)
            p = jnp.exp(s - m_new)
            l_new = alpha * l_i + jnp.sum(p, axis=-1, keepdims=True)
            acc_new = alpha * acc + jnp.einsum(
                'hqk,hkd->hqd', p.astype(cdt), v_blk,
                preferred_element_type=jnp.float32)
            return m_new, l_new, acc_new

        m0 = jnp.full((H, TQ, 1), -jnp.inf, jnp.float32)
        l0 = jnp.zeros((H, TQ, 1), jnp.float32)
        a0 = jnp.zeros((H, TQ, D), jnp.float32)
        _, l_f, acc = lax.fori_loop(0, n_kv, body, (m0, l0, a0))
        attn = acc * pl.reciprocal(l_f, approx=True)

    attn = jnp.transpose(attn, (1, 0, 2)).reshape(TQ, E)                # (TQ, E) f32

    # ---- output projection ----
    attn_out = jnp.dot(attn.astype(cdt), wo_ref[...],
                       preferred_element_type=jnp.float32) + bo_ref[0]

    # ---- residual + LayerNorm (stats in f32, exact residual from f32 x) ----
    x1 = x_q.astype(jnp.float32) + attn_out
    mean = jnp.mean(x1, axis=-1, keepdims=True)
    var = jnp.mean(jnp.square(x1 - mean), axis=-1, keepdims=True)
    xn = (x1 - mean) * lax.rsqrt(var + 1e-5)
    xn = xn * ln_w_ref[0] + ln_b_ref[0]

    # ---- MLP: Linear(E,4E) -> ReLU -> Linear(4E,E) ----
    h1 = jnp.dot(xn.astype(cdt), w1_ref[...],
                 preferred_element_type=jnp.float32) + b1_ref[0]
    h1 = jnp.maximum(h1, 0.0)
    mlp = jnp.dot(h1.astype(cdt), w2_ref[...],
                  preferred_element_type=jnp.float32) + b2_ref[0]

    # ---- final residual ----
    o_ref[0] = (xn + mlp).astype(o_ref.dtype)


def self_attention_forward(x, params, num_heads, compute_dtype=jnp.bfloat16):
    B, S, E = x.shape
    assert E % num_heads == 0, "embed_dim must be divisible by num_heads"
    D = E // num_heads
    (in_w, in_b, out_w, out_b, ln_w, ln_b, w1, b1, w2, b2) = params

    # Pre-transpose / pre-split / pre-cast weights ONCE on the host so every
    # in-kernel matmul is a plain bf16 (M,K)@(K,N) MXU feed with no relayout.
    in_wt = in_w.T                                              # (E, 3E)
    wq = in_wt[:, :E].astype(compute_dtype)                     # (E, E)
    wk = in_wt[:, E:2 * E].astype(compute_dtype)                # (E, E)
    wv = in_wt[:, 2 * E:].astype(compute_dtype)                 # (E, E)
    bq, bk, bv = in_b[:, :E], in_b[:, E:2 * E], in_b[:, 2 * E:]  # f32 (1, E)
    wo = out_w.T.astype(compute_dtype)                          # (E, E)
    w1t = w1.T.astype(compute_dtype)                            # (E, 4E)
    w2t = w2.T.astype(compute_dtype)                            # (4E, E)

    # Query tiling: 256-row tiles (256-wide MXU on v6e/v7x), else 128, else S.
    # TODO(synk): pad S (or handle a ragged last tile) instead of falling back
    # to TQ=S for very large sequences that are not a multiple of 128.
    if S % 256 == 0:
        TQ = 256
    elif S % 128 == 0:
        TQ = 128
    else:
        TQ = S
    NQ = S // TQ

    # KV tile for the online-softmax path (only used when S is large enough
    # that a full (H, TQ, S) f32 score block would be a VMEM problem).
    if S <= 512:
        TKV = S
    elif S % 512 == 0:
        TKV = 512
    elif S % 256 == 0:
        TKV = 256
    elif S % 128 == 0:
        TKV = 128
    else:
        TKV = S

    def rep_spec(arr):
        n = arr.ndim
        idx = lambda b, t: (0,) * n
        # Constant-index weight blocks never change -> single-buffer them so
        # each weight is resident exactly once in VMEM (default is 2-deep).
        try:
            return pl.BlockSpec(arr.shape, idx, pipeline_mode=pl.Buffered(1))
        except Exception:
            return pl.BlockSpec(arr.shape, idx)

    weights = (wq, bq, wk, bk, wv, bv, wo, out_b, ln_w, ln_b, w1t, b1, w2t, b2)

    # VMEM budget from the real working set: single-buffered weights,
    # double-buffered x/out blocks, K/V scratch, f32 intermediates; capped
    # below the physical per-core VMEM capacity.
    weight_bytes = sum(int(w.size) * w.dtype.itemsize for w in weights)
    io_bytes = 2 * (S * E + 2 * TQ * E) * x.dtype.itemsize
    scratch_bytes = 2 * num_heads * S * D * jnp.dtype(compute_dtype).itemsize
    f32_tmp = 4 * (2 * S * E                            # k/v projections (t==0)
                   + 3 * num_heads * TQ * min(TKV, S)   # scores / softmax temps
                   + TQ * 4 * E                         # MLP hidden
                   + 8 * TQ * E)                        # misc activations
    needed = weight_bytes + io_bytes + scratch_bytes + 2 * f32_tmp
    try:
        phys_vmem = int(pltpu.get_tpu_info().vmem_capacity_bytes)
    except Exception:
        phys_vmem = 64 * 1024 * 1024                    # conservative (v7x)
    vmem_limit = int(min(phys_vmem - 16 * 1024 * 1024,
                         max(32 * 1024 * 1024, needed)))

    kernel = functools.partial(self_attention_kernel, num_heads=num_heads,
                               q_tile=TQ, kv_tile=TKV)

    return pl.pallas_call(
        kernel,
        out_shape=jax.ShapeDtypeStruct((B, S, E), x.dtype),
        grid=(B, NQ),
        in_specs=[
            pl.BlockSpec((1, S, E), lambda b, t: (b, 0, 0)),    # x, full seq (K/V)
            pl.BlockSpec((1, TQ, E), lambda b, t: (b, t, 0)),   # x, query tile
        ] + [rep_spec(w) for w in weights],
        out_specs=pl.BlockSpec((1, TQ, E), lambda b, t: (b, t, 0)),
        scratch_shapes=[
            pltpu.VMEM((num_heads, S, D), compute_dtype),       # K heads (persistent)
            pltpu.VMEM((num_heads, S, D), compute_dtype),       # V heads (persistent)
        ],
        compiler_params=pltpu.CompilerParams(
            # t must be 'arbitrary': K/V scratch written at t == 0 is reused by
            # later query tiles of the same batch element. b stays 'parallel'
            # for megacore sharding.
            dimension_semantics=("parallel", "arbitrary"),
            vmem_limit_bytes=vmem_limit),
    )(x, x, *weights)


def reference_forward(x, params, num_heads):
    """Pure-JAX f32 reference replicating nn.MultiheadAttention + LayerNorm + MLP."""
    (in_w, in_b, out_w, out_b, ln_w, ln_b, w1, b1, w2, b2) = params
    B, S, E = x.shape
    D = E // num_heads
    qkv = jnp.einsum("bse,fe->bsf", x, in_w) + in_b[0]
    q, k, v = qkv[..., :E], qkv[..., E:2 * E], qkv[..., 2 * E:]

    def split_heads(t):  # (B,S,E) -> (B,H,S,D)
        return t.reshape(B, S, num_heads, D).transpose(0, 2, 1, 3)

    qh, kh, vh = split_heads(q), split_heads(k), split_heads(v)
    s = jnp.einsum("bhqd,bhkd->bhqk", qh, kh) / (D ** 0.5)
    p = jax.nn.softmax(s, axis=-1)
    a = jnp.einsum("bhqk,bhkd->bhqd", p, vh).transpose(0, 2, 1, 3).reshape(B, S, E)
    attn_out = jnp.einsum("bse,fe->bsf", a, out_w) + out_b[0]

    x1 = x + attn_out
    mean = jnp.mean(x1, axis=-1, keepdims=True)
    var = jnp.mean((x1 - mean) ** 2, axis=-1, keepdims=True)
    xn = (x1 - mean) / jnp.sqrt(var + 1e-5) * ln_w[0] + ln_b[0]

    h1 = jnp.maximum(jnp.einsum("bse,fe->bsf", xn, w1) + b1[0], 0.0)
    mlp = jnp.einsum("bsf,ef->bse", h1, w2) + b2[0]
    return xn + mlp


def init_params(key, embed_dim):
    E = embed_dim
    ks = jax.random.split(key, 6)
    in_w = jax.random.normal(ks[0], (3 * E, E), jnp.float32) * 0.1
    in_b = jnp.zeros((1, 3 * E), jnp.float32)
    out_w = jax.random.normal(ks[1], (E, E), jnp.float32) * 0.1
    out_b = jnp.zeros((1, E), jnp.float32)
    ln_w = jnp.ones((1, E), jnp.float32)
    ln_b = jnp.zeros((1, E), jnp.float32)
    w1 = jax.random.normal(ks[2], (4 * E, E), jnp.float32) * 0.1
    b1 = jax.random.normal(ks[3], (1, 4 * E), jnp.float32) * 0.01
    w2 = jax.random.normal(ks[4], (E, 4 * E), jnp.float32) * 0.1
    b2 = jax.random.normal(ks[5], (1, E), jnp.float32) * 0.01
    return (in_w, in_b, out_w, out_b, ln_w, ln_b, w1, b1, w2, b2)


if __name__ == "__main__":
    B, S, E, H = 2, 8, 32, 4
    key = jax.random.PRNGKey(0)
    k_x, k_p = jax.random.split(key)
    x = jax.random.normal(k_x, (B, S, E), jnp.float32)
    params = init_params(k_p, E)

    out = self_attention_forward(x, params, num_heads=H)
    out = jax.block_until_ready(out)

    ref = reference_forward(x, params, num_heads=H)
    assert out.shape == (B, S, E)
    err = jnp.max(jnp.abs(out - ref))
    # bf16 MXU operands (f32 accumulation) -> relaxed tolerance vs f32 reference.
    assert jnp.allclose(out, ref, atol=5e-2, rtol=5e-2), f"max abs err {err}"

    print("KERNEL_OK")
</pallas_src>

<mosaic_0001>
module attributes {stable_mosaic.version = 11 : i64} {
  func.func @self_attention_kernel(%arg0: i32, %arg1: i32, %arg2: memref<1x8x32xf32, #tpu.memory_space<vmem>>, %arg3: memref<1x8x32xf32, #tpu.memory_space<vmem>>, %arg4: memref<32x32xbf16, #tpu.memory_space<vmem>>, %arg5: memref<1x32xf32, #tpu.memory_space<vmem>>, %arg6: memref<32x32xbf16, #tpu.memory_space<vmem>>, %arg7: memref<1x32xf32, #tpu.memory_space<vmem>>, %arg8: memref<32x32xbf16, #tpu.memory_space<vmem>>, %arg9: memref<1x32xf32, #tpu.memory_space<vmem>>, %arg10: memref<32x32xbf16, #tpu.memory_space<vmem>>, %arg11: memref<1x32xf32, #tpu.memory_space<vmem>>, %arg12: memref<1x32xf32, #tpu.memory_space<vmem>>, %arg13: memref<1x32xf32, #tpu.memory_space<vmem>>, %arg14: memref<32x128xbf16, #tpu.memory_space<vmem>>, %arg15: memref<1x128xf32, #tpu.memory_space<vmem>>, %arg16: memref<128x32xbf16, #tpu.memory_space<vmem>>, %arg17: memref<1x32xf32, #tpu.memory_space<vmem>>, %arg18: memref<1x8x32xf32, #tpu.memory_space<vmem>>, %arg19: memref<4x8x8xbf16, #tpu.memory_space<vmem>>, %arg20: memref<4x8x8xbf16, #tpu.memory_space<vmem>>) attributes {dimension_semantics = [#tpu.dimension_semantics<parallel>, #tpu.dimension_semantics<arbitrary>], iteration_bounds = array<i64: 2, 1>, scalar_prefetch = 0 : i64, scratch_operands = 2 : i64, tpu.core_type = #tpu.core_type<tc>, window_params = [{transform_indices = @transform_0, window_bounds = array<i64: 1, 8, 32>}, {transform_indices = @transform_1, window_bounds = array<i64: 1, 8, 32>}, {pipeline_mode = #tpu.pipeline_mode<synchronous>, transform_indices = @transform_2, window_bounds = array<i64: 32, 32>}, {pipeline_mode = #tpu.pipeline_mode<synchronous>, transform_indices = @transform_3, window_bounds = array<i64: 1, 32>}, {pipeline_mode = #tpu.pipeline_mode<synchronous>, transform_indices = @transform_4, window_bounds = array<i64: 32, 32>}, {pipeline_mode = #tpu.pipeline_mode<synchronous>, transform_indices = @transform_5, window_bounds = array<i64: 1, 32>}, {pipeline_mode = #tpu.pipeline_mode<synchronous>, transform_indices = @transform_6, window_bounds = array<i64: 32, 32>}, {pipeline_mode = #tpu.pipeline_mode<synchronous>, transform_indices = @transform_7, window_bounds = array<i64: 1, 32>}, {pipeline_mode = #tpu.pipeline_mode<synchronous>, transform_indices = @transform_8, window_bounds = array<i64: 32, 32>}, {pipeline_mode = #tpu.pipeline_mode<synchronous>, transform_indices = @transform_9, window_bounds = array<i64: 1, 32>}, {pipeline_mode = #tpu.pipeline_mode<synchronous>, transform_indices = @transform_10, window_bounds = array<i64: 1, 32>}, {pipeline_mode = #tpu.pipeline_mode<synchronous>, transform_indices = @transform_11, window_bounds = array<i64: 1, 32>}, {pipeline_mode = #tpu.pipeline_mode<synchronous>, transform_indices = @transform_12, window_bounds = array<i64: 32, 128>}, {pipeline_mode = #tpu.pipeline_mode<synchronous>, transform_indices = @transform_13, window_bounds = array<i64: 1, 128>}, {pipeline_mode = #tpu.pipeline_mode<synchronous>, transform_indices = @transform_14, window_bounds = array<i64: 128, 32>}, {pipeline_mode = #tpu.pipeline_mode<synchronous>, transform_indices = @transform_15, window_bounds = array<i64: 1, 32>}, {transform_indices = @transform_16, window_bounds = array<i64: 1, 8, 32>}]} {
    %c0_i32 = arith.constant 0 : i32
    %0 = arith.cmpi eq, %arg1, %c0_i32 : i32
    %1 = arith.extui %0 : i1 to i32
    %c0_i32_0 = arith.constant 0 : i32
    %2 = arith.cmpi ne, %1, %c0_i32_0 : i32
    scf.if %2 {
      %c0_46 = arith.constant 0 : index
      %c0_47 = arith.constant 0 : index
      %c0_48 = arith.constant 0 : index
      %94 = vector.load %arg2[%c0_46, %c0_47, %c0_48] : memref<1x8x32xf32, #tpu.memory_space<vmem>>, vector<1x8x32xf32>
      %95 = vector.shape_cast %94 : vector<1x8x32xf32> to vector<8x32xf32>
      %96 = arith.truncf %95 : vector<8x32xf32> to vector<8x32xbf16>
      %c0_49 = arith.constant 0 : index
      %c0_50 = arith.constant 0 : index
      %97 = vector.load %arg6[%c0_49, %c0_50] : memref<32x32xbf16, #tpu.memory_space<vmem>>, vector<32x32xbf16>
      %cst_51 = arith.constant dense<0.000000e+00> : vector<8x32xf32>
      %98 = tpu.matmul %96, %97, %cst_51 {dimension_numbers = #tpu.dot_dimension_numbers<[1], [0], [0], [1], [0, 0, 1, 1], [], []>} : vector<8x32xbf16>, vector<32x32xbf16>, vector<8x32xf32> -> vector<8x32xf32>
      %c0_52 = arith.constant 0 : index
      %c0_53 = arith.constant 0 : index
      %99 = vector.load %arg7[%c0_52, %c0_53] : memref<1x32xf32, #tpu.memory_space<vmem>>, vector<1x32xf32>
      %100 = vector.shape_cast %99 : vector<1x32xf32> to vector<32xf32>
      %101 = vector.shape_cast %100 : vector<32xf32> to vector<1x32xf32>
      %102 = vector.broadcast %101 : vector<1x32xf32> to vector<8x32xf32>
      %103 = arith.addf %98, %102 : vector<8x32xf32>
      %c0_54 = arith.constant 0 : index
      %c0_55 = arith.constant 0 : index
      %104 = vector.load %arg8[%c0_54, %c0_55] : memref<32x32xbf16, #tpu.memory_space<vmem>>, vector<32x32xbf16>
      %cst_56 = arith.constant dense<0.000000e+00> : vector<8x32xf32>
      %105 = tpu.matmul %96, %104, %cst_56 {dimension_numbers = #tpu.dot_dimension_numbers<[1], [0], [0], [1], [0, 0, 1, 1], [], []>} : vector<8x32xbf16>, vector<32x32xbf16>, vector<8x32xf32> -> vector<8x32xf32>
      %c0_57 = arith.constant 0 : index
      %c0_58 = arith.constant 0 : index
      %106 = vector.load %arg9[%c0_57, %c0_58] : memref<1x32xf32, #tpu.memory_space<vmem>>, vector<1x32xf32>
      %107 = vector.shape_cast %106 : vector<1x32xf32> to vector<32xf32>
      %108 = vector.shape_cast %107 : vector<32xf32> to vector<1x32xf32>
      %109 = vector.broadcast %108 : vector<1x32xf32> to vector<8x32xf32>
      %110 = arith.addf %105, %109 : vector<8x32xf32>
      %111 = vector.shape_cast %103 : vector<8x32xf32> to vector<8x4x8xf32>
      %112 = tpu.transpose %111, [1, 0, 2] : vector<8x4x8xf32> -> vector<4x8x8xf32>
      %113 = arith.truncf %112 : vector<4x8x8xf32> to vector<4x8x8xbf16>
      %c0_59 = arith.constant 0 : index
      %c0_60 = arith.constant 0 : index
      %c0_61 = arith.constant 0 : index
      %114 = vector.load %arg19[%c0_59, %c0_60, %c0_61] : memref<4x8x8xbf16, #tpu.memory_space<vmem>>, vector<4x8x8xbf16>
      tpu.vector_store %arg19[%c0_59, %c0_60, %c0_61], %113 {strides = array<i32>} : memref<4x8x8xbf16, #tpu.memory_space<vmem>>, vector<4x8x8xbf16>,
      %115 = vector.shape_cast %110 : vector<8x32xf32> to vector<8x4x8xf32>
      %116 = tpu.transpose %115, [1, 0, 2] : vector<8x4x8xf32> -> vector<4x8x8xf32>
      %117 = arith.truncf %116 : vector<4x8x8xf32> to vector<4x8x8xbf16>
      %c0_62 = arith.constant 0 : index
      %c0_63 = arith.constant 0 : index
      %c0_64 = arith.constant 0 : index
      %118 = vector.load %arg20[%c0_62, %c0_63, %c0_64] : memref<4x8x8xbf16, #tpu.memory_space<vmem>>, vector<4x8x8xbf16>
      tpu.vector_store %arg20[%c0_62, %c0_63, %c0_64], %117 {strides = array<i32>} : memref<4x8x8xbf16, #tpu.memory_space<vmem>>, vector<4x8x8xbf16>,
    } else {
    }
    %c0 = arith.constant 0 : index
    %c0_1 = arith.constant 0 : index
    %c0_2 = arith.constant 0 : index
    %3 = vector.load %arg3[%c0, %c0_1, %c0_2] : memref<1x8x32xf32, #tpu.memory_space<vmem>>, vector<1x8x32xf32>
    %4 = vector.shape_cast %3 : vector<1x8x32xf32> to vector<8x32xf32>
    %5 = arith.truncf %4 : vector<8x32xf32> to vector<8x32xbf16>
    %c0_3 = arith.constant 0 : index
    %c0_4 = arith.constant 0 : index
    %6 = vector.load %arg4[%c0_3, %c0_4] : memref<32x32xbf16, #tpu.memory_space<vmem>>, vector<32x32xbf16>
    %cst = arith.constant dense<0.000000e+00> : vector<8x32xf32>
    %7 = tpu.matmul %5, %6, %cst {dimension_numbers = #tpu.dot_dimension_numbers<[1], [0], [0], [1], [0, 0, 1, 1], [], []>} : vector<8x32xbf16>, vector<32x32xbf16>, vector<8x32xf32> -> vector<8x32xf32>
    %c0_5 = arith.constant 0 : index
    %c0_6 = arith.constant 0 : index
    %8 = vector.load %arg5[%c0_5, %c0_6] : memref<1x32xf32, #tpu.memory_space<vmem>>, vector<1x32xf32>
    %9 = vector.shape_cast %8 : vector<1x32xf32> to vector<32xf32>
    %10 = vector.shape_cast %9 : vector<32xf32> to vector<1x32xf32>
    %11 = vector.broadcast %10 : vector<1x32xf32> to vector<8x32xf32>
    %12 = arith.addf %7, %11 : vector<8x32xf32>
    %cst_7 = arith.constant 0.353553385 : f32
    %13 = vector.broadcast %cst_7 : f32 to vector<8x32xf32>
    %14 = arith.mulf %12, %13 : vector<8x32xf32>
    %15 = vector.shape_cast %14 : vector<8x32xf32> to vector<8x4x8xf32>
    %16 = tpu.transpose %15, [1, 0, 2] : vector<8x4x8xf32> -> vector<4x8x8xf32>
    %17 = arith.truncf %16 : vector<4x8x8xf32> to vector<4x8x8xbf16>
    %c0_8 = arith.constant 0 : index
    %c0_9 = arith.constant 0 : index
    %c0_10 = arith.constant 0 : index
    %18 = vector.load %arg19[%c0_8, %c0_9, %c0_10] : memref<4x8x8xbf16, #tpu.memory_space<vmem>>, vector<4x8x8xbf16>
    "tpu.trace_start"() <{level = 10 : i32, message = "hqd,hkd->hqk"}> : () -> ()
    %cst_11 = arith.constant dense<0.000000e+00> : vector<4x8x8xf32>
    %19 = tpu.matmul %17, %18, %cst_11 {dimension_numbers = #tpu.dot_dimension_numbers<[2], [2], [1], [1], [0, 0, 0, 1, 1, 1], [0], [0]>} : vector<4x8x8xbf16>, vector<4x8x8xbf16>, vector<4x8x8xf32> -> vector<4x8x8xf32>
    "tpu.trace_stop"() : () -> ()
    %cst_12 = arith.constant dense<0xFF800000> : vector<4x8xf32>
    %20 = vector.multi_reduction <maximumf>, %19, %cst_12 [2] : vector<4x8x8xf32> to vector<4x8xf32>
    %21 = vector.shape_cast %20 : vector<4x8xf32> to vector<4x8x1xf32>
    %22 = vector.broadcast %21 : vector<4x8x1xf32> to vector<4x8x8xf32>
    %23 = arith.subf %19, %22 : vector<4x8x8xf32>
    %24 = math.exp %23 : vector<4x8x8xf32>
    %cst_13 = arith.constant dense<0.000000e+00> : vector<4x8xf32>
    %25 = vector.multi_reduction <add>, %24, %cst_13 [2] : vector<4x8x8xf32> to vector<4x8xf32>
    %26 = vector.shape_cast %25 : vector<4x8xf32> to vector<4x8x1xf32>
    %27 = tpu.reciprocal %26 {approx = true} : vector<4x8x1xf32> -> vector<4x8x1xf32>
    %28 = vector.broadcast %27 : vector<4x8x1xf32> to vector<4x8x8xf32>
    %29 = arith.mulf %24, %28 : vector<4x8x8xf32>
    %30 = arith.truncf %29 : vector<4x8x8xf32> to vector<4x8x8xbf16>
    %c0_14 = arith.constant 0 : index
    %c0_15 = arith.constant 0 : index
    %c0_16 = arith.constant 0 : index
    %31 = vector.load %arg20[%c0_14, %c0_15, %c0_16] : memref<4x8x8xbf16, #tpu.memory_space<vmem>>, vector<4x8x8xbf16>
    "tpu.trace_start"() <{level = 10 : i32, message = "hqk,hkd->hqd"}> : () -> ()
    %cst_17 = arith.constant dense<0.000000e+00> : vector<4x8x8xf32>
    %32 = tpu.matmul %30, %31, %cst_17 {dimension_numbers = #tpu.dot_dimension_numbers<[2], [1], [1], [2], [0, 0, 0, 1, 1, 2], [0], [0]>} : vector<4x8x8xbf16>, vector<4x8x8xbf16>, vector<4x8x8xf32> -> vector<4x8x8xf32>
    "tpu.trace_stop"() : () -> ()
    %33 = tpu.transpose %32, [1, 0, 2] : vector<4x8x8xf32> -> vector<8x4x8xf32>
    %34 = vector.shape_cast %33 : vector<8x4x8xf32> to vector<8x32xf32>
    %35 = arith.truncf %34 : vector<8x32xf32> to vector<8x32xbf16>
    %c0_18 = arith.constant 0 : index
    %c0_19 = arith.constant 0 : index
    %36 = vector.load %arg10[%c0_18, %c0_19] : memref<32x32xbf16, #tpu.memory_space<vmem>>, vector<32x32xbf16>
    %cst_20 = arith.constant dense<0.000000e+00> : vector<8x32xf32>
    %37 = tpu.matmul %35, %36, %cst_20 {dimension_numbers = #tpu.dot_dimension_numbers<[1], [0], [0], [1], [0, 0, 1, 1], [], []>} : vector<8x32xbf16>, vector<32x32xbf16>, vector<8x32xf32> -> vector<8x32xf32>
    %c0_21 = arith.constant 0 : index
    %c0_22 = arith.constant 0 : index
    %38 = vector.load %arg11[%c0_21, %c0_22] : memref<1x32xf32, #tpu.memory_space<vmem>>, vector<1x32xf32>
    %39 = vector.shape_cast %38 : vector<1x32xf32> to vector<32xf32>
    %40 = vector.shape_cast %39 : vector<32xf32> to vector<1x32xf32>
    %41 = vector.broadcast %40 : vector<1x32xf32> to vector<8x32xf32>
    %42 = arith.addf %37, %41 : vector<8x32xf32>
    %43 = arith.addf %4, %42 : vector<8x32xf32>
    %cst_23 = arith.constant dense<0.000000e+00> : vector<8xf32>
    %44 = vector.multi_reduction <add>, %43, %cst_23 [1] : vector<8x32xf32> to vector<8xf32>
    %45 = vector.shape_cast %44 : vector<8xf32> to vector<8x1xf32>
    %cst_24 = arith.constant 3.200000e+01 : f32
    %46 = vector.broadcast %cst_24 : f32 to vector<8x1xf32>
    %47 = arith.divf %45, %46 : vector<8x1xf32>
    %48 = vector.broadcast %47 : vector<8x1xf32> to vector<8x32xf32>
    %49 = arith.subf %43, %48 : vector<8x32xf32>
    %50 = arith.mulf %49, %49 : vector<8x32xf32>
    %cst_25 = arith.constant dense<0.000000e+00> : vector<8xf32>
    %51 = vector.multi_reduction <add>, %50, %cst_25 [1] : vector<8x32xf32> to vector<8xf32>
    %52 = vector.shape_cast %51 : vector<8xf32> to vector<8x1xf32>
    %cst_26 = arith.constant 3.200000e+01 : f32
    %53 = vector.broadcast %cst_26 : f32 to vector<8x1xf32>
    %54 = arith.divf %52, %53 : vector<8x1xf32>
    %55 = vector.broadcast %47 : vector<8x1xf32> to vector<8x32xf32>
    %56 = arith.subf %43, %55 : vector<8x32xf32>
    %cst_27 = arith.constant 9.99999974E-6 : f32
    %57 = vector.broadcast %cst_27 : f32 to vector<8x1xf32>
    %58 = arith.addf %54, %57 : vector<8x1xf32>
    %59 = math.rsqrt %58 : vector<8x1xf32>
    %60 = vector.broadcast %59 : vector<8x1xf32> to vector<8x32xf32>
    %61 = arith.mulf %56, %60 : vector<8x32xf32>
    %c0_28 = arith.constant 0 : index
    %c0_29 = arith.constant 0 : index
    %62 = vector.load %arg12[%c0_28, %c0_29] : memref<1x32xf32, #tpu.memory_space<vmem>>, vector<1x32xf32>
    %63 = vector.shape_cast %62 : vector<1x32xf32> to vector<32xf32>
    %64 = vector.shape_cast %63 : vector<32xf32> to vector<1x32xf32>
    %65 = vector.broadcast %64 : vector<1x32xf32> to vector<8x32xf32>
    %66 = arith.mulf %61, %65 : vector<8x32xf32>
    %c0_30 = arith.constant 0 : index
    %c0_31 = arith.constant 0 : index
    %67 = vector.load %arg13[%c0_30, %c0_31] : memref<1x32xf32, #tpu.memory_space<vmem>>, vector<1x32xf32>
    %68 = vector.shape_cast %67 : vector<1x32xf32> to vector<32xf32>
    %69 = vector.shape_cast %68 : vector<32xf32> to vector<1x32xf32>
    %70 = vector.broadcast %69 : vector<1x32xf32> to vector<8x32xf32>
    %71 = arith.addf %66, %70 : vector<8x32xf32>
    %72 = arith.truncf %71 : vector<8x32xf32> to vector<8x32xbf16>
    %c0_32 = arith.constant 0 : index
    %c0_33 = arith.constant 0 : index
    %73 = vector.load %arg14[%c0_32, %c0_33] : memref<32x128xbf16, #tpu.memory_space<vmem>>, vector<32x128xbf16>
    %cst_34 = arith.constant dense<0.000000e+00> : vector<8x128xf32>
    %74 = tpu.matmul %72, %73, %cst_34 {dimension_numbers = #tpu.dot_dimension_numbers<[1], [0], [0], [1], [0, 0, 1, 1], [], []>} : vector<8x32xbf16>, vector<32x128xbf16>, vector<8x128xf32> -> vector<8x128xf32>
    %c0_35 = arith.constant 0 : index
    %c0_36 = arith.constant 0 : index
    %75 = vector.load %arg15[%c0_35, %c0_36] : memref<1x128xf32, #tpu.memory_space<vmem>>, vector<1x128xf32>
    %76 = vector.shape_cast %75 : vector<1x128xf32> to vector<128xf32>
    %77 = vector.shape_cast %76 : vector<128xf32> to vector<1x128xf32>
    %78 = vector.broadcast %77 : vector<1x128xf32> to vector<8x128xf32>
    %79 = arith.addf %74, %78 : vector<8x128xf32>
    %cst_37 = arith.constant 0.000000e+00 : f32
    %80 = vector.broadcast %cst_37 : f32 to vector<8x128xf32>
    %81 = arith.maximumf %79, %80 : vector<8x128xf32>
    %82 = arith.truncf %81 : vector<8x128xf32> to vector<8x128xbf16>
    %c0_38 = arith.constant 0 : index
    %c0_39 = arith.constant 0 : index
    %83 = vector.load %arg16[%c0_38, %c0_39] : memref<128x32xbf16, #tpu.memory_space<vmem>>, vector<128x32xbf16>
    %cst_40 = arith.constant dense<0.000000e+00> : vector<8x32xf32>
    %84 = tpu.matmul %82, %83, %cst_40 {dimension_numbers = #tpu.dot_dimension_numbers<[1], [0], [0], [1], [0, 0, 1, 1], [], []>} : vector<8x128xbf16>, vector<128x32xbf16>, vector<8x32xf32> -> vector<8x32xf32>
    %c0_41 = arith.constant 0 : index
    %c0_42 = arith.constant 0 : index
    %85 = vector.load %arg17[%c0_41, %c0_42] : memref<1x32xf32, #tpu.memory_space<vmem>>, vector<1x32xf32>
    %86 = vector.shape_cast %85 : vector<1x32xf32> to vector<32xf32>
    %87 = vector.shape_cast %86 : vector<32xf32> to vector<1x32xf32>
    %88 = vector.broadcast %87 : vector<1x32xf32> to vector<8x32xf32>
    %89 = arith.addf %84, %88 : vector<8x32xf32>
    %90 = arith.addf %71, %89 : vector<8x32xf32>
    %c0_43 = arith.constant 0 : index
    %c0_44 = arith.constant 0 : index
    %c0_45 = arith.constant 0 : index
    %91 = vector.load %arg18[%c0_43, %c0_44, %c0_45] : memref<1x8x32xf32, #tpu.memory_space<vmem>>, vector<1x8x32xf32>
    %92 = vector.shape_cast %91 : vector<1x8x32xf32> to vector<8x32xf32>
    %93 = vector.shape_cast %90 : vector<8x32xf32> to vector<1x8x32xf32>
    tpu.vector_store %arg18[%c0_43, %c0_44, %c0_45], %93 {strides = array<i32>} : memref<1x8x32xf32, #tpu.memory_space<vmem>>, vector<1x8x32xf32>,
    return
  }
  func.func @transform_0(%arg0: i32, %arg1: i32) -> (i32, i32, i32) {
    %c0_i32 = arith.constant 0 : i32
    %c0_i32_0 = arith.constant 0 : i32
    %c0_i32_1 = arith.constant 0 : i32
    return %arg0, %c0_i32, %c0_i32_0 : i32, i32, i32
  }
  func.func @transform_1(%arg0: i32, %arg1: i32) -> (i32, i32, i32) {
    %c0_i32 = arith.constant 0 : i32
    %c0_i32_0 = arith.constant 0 : i32
    return %arg0, %arg1, %c0_i32 : i32, i32, i32
  }
  func.func @transform_2(%arg0: i32, %arg1: i32) -> (i32, i32) {
    %c0_i32 = arith.constant 0 : i32
    %c0_i32_0 = arith.constant 0 : i32
    %c0_i32_1 = arith.constant 0 : i32
    return %c0_i32, %c0_i32_0 : i32, i32
  }
  func.func @transform_3(%arg0: i32, %arg1: i32) -> (i32, i32) {
    %c0_i32 = arith.constant 0 : i32
    %c0_i32_0 = arith.constant 0 : i32
    %c0_i32_1 = arith.constant 0 : i32
    return %c0_i32, %c0_i32_0 : i32, i32
  }
  func.func @transform_4(%arg0: i32, %arg1: i32) -> (i32, i32) {
    %c0_i32 = arith.constant 0 : i32
    %c0_i32_0 = arith.constant 0 : i32
    %c0_i32_1 = arith.constant 0 : i32
    return %c0_i32, %c0_i32_0 : i32, i32
  }
  func.func @transform_5(%arg0: i32, %arg1: i32) -> (i32, i32) {
    %c0_i32 = arith.constant 0 : i32
    %c0_i32_0 = arith.constant 0 : i32
    %c0_i32_1 = arith.constant 0 : i32
    return %c0_i32, %c0_i32_0 : i32, i32
  }
  func.func @transform_6(%arg0: i32, %arg1: i32) -> (i32, i32) {
    %c0_i32 = arith.constant 0 : i32
    %c0_i32_0 = arith.constant 0 : i32
    %c0_i32_1 = arith.constant 0 : i32
    return %c0_i32, %c0_i32_0 : i32, i32
  }
  func.func @transform_7(%arg0: i32, %arg1: i32) -> (i32, i32) {
    %c0_i32 = arith.constant 0 : i32
    %c0_i32_0 = arith.constant 0 : i32
    %c0_i32_1 = arith.constant 0 : i32
    return %c0_i32, %c0_i32_0 : i32, i32
  }
  func.func @transform_8(%arg0: i32, %arg1: i32) -> (i32, i32) {
    %c0_i32 = arith.constant 0 : i32
    %c0_i32_0 = arith.constant 0 : i32
    %c0_i32_1 = arith.constant 0 : i32
    return %c0_i32, %c0_i32_0 : i32, i32
  }
  func.func @transform_9(%arg0: i32, %arg1: i32) -> (i32, i32) {
    %c0_i32 = arith.constant 0 : i32
    %c0_i32_0 = arith.constant 0 : i32
    %c0_i32_1 = arith.constant 0 : i32
    return %c0_i32, %c0_i32_0 : i32, i32
  }
  func.func @transform_10(%arg0: i32, %arg1: i32) -> (i32, i32) {
    %c0_i32 = arith.constant 0 : i32
    %c0_i32_0 = arith.constant 0 : i32
    %c0_i32_1 = arith.constant 0 : i32
    return %c0_i32, %c0_i32_0 : i32, i32
  }
  func.func @transform_11(%arg0: i32, %arg1: i32) -> (i32, i32) {
    %c0_i32 = arith.constant 0 : i32
    %c0_i32_0 = arith.constant 0 : i32
    %c0_i32_1 = arith.constant 0 : i32
    return %c0_i32, %c0_i32_0 : i32, i32
  }
  func.func @transform_12(%arg0: i32, %arg1: i32) -> (i32, i32) {
    %c0_i32 = arith.constant 0 : i32
    %c0_i32_0 = arith.constant 0 : i32
    %c0_i32_1 = arith.constant 0 : i32
    return %c0_i32, %c0_i32_0 : i32, i32
  }
  func.func @transform_13(%arg0: i32, %arg1: i32) -> (i32, i32) {
    %c0_i32 = arith.constant 0 : i32
    %c0_i32_0 = arith.constant 0 : i32
    %c0_i32_1 = arith.constant 0 : i32
    return %c0_i32, %c0_i32_0 : i32, i32
  }
  func.func @transform_14(%arg0: i32, %arg1: i32) -> (i32, i32) {
    %c0_i32 = arith.constant 0 : i32
    %c0_i32_0 = arith.constant 0 : i32
    %c0_i32_1 = arith.constant 0 : i32
    return %c0_i32, %c0_i32_0 : i32, i32
  }
  func.func @transform_15(%arg0: i32, %arg1: i32) -> (i32, i32) {
    %c0_i32 = arith.constant 0 : i32
    %c0_i32_0 = arith.constant 0 : i32
    %c0_i32_1 = arith.constant 0 : i32
    return %c0_i32, %c0_i32_0 : i32, i32
  }
  func.func @transform_16(%arg0: i32, %arg1: i32) -> (i32, i32, i32) {
    %c0_i32 = arith.constant 0 : i32
    %c0_i32_0 = arith.constant 0 : i32
    return %arg0, %arg1, %c0_i32 : i32, i32, i32
  }
}

</mosaic_0001>

<bundles_post_ra>
// kernel: tpu_custom_call.1
= control target key start
LH: loop header
LB: loop body
LE: loop exit
PB: predicated region body
PF: predicated region fallthrough
CT: control target
= control target key end

     0   :  { %s3343_s0 = inlined_call_operand.vmem [shape: f32[2,8,32], index: 0, kind: input, shape index: {}]   ;;  %s3344_s1 = inlined_call_operand.vmem [shape: f32[2,8,32], index: 1, kind: input, shape index: {}]   ;;  %s3345_s2 = inlined_call_operand.vmem [shape: bf16[32,32], index: 2, kind: input, shape index: {}]   ;;  %s3346_s3 = inlined_call_operand.vmem [shape: f32[1,32], index: 3, kind: input, shape index: {}]   ;;  %s3347_s4 = inlined_call_operand.vmem [shape: bf16[32,32], index: 4, kind: input, shape index: {}]   ;;  %s3348_s5 = inlined_call_operand.vmem [shape: f32[1,32], index: 5, kind: input, shape index: {}]   ;;  %s3349_s6 = inlined_call_operand.vmem [shape: bf16[32,32], index: 6, kind: input, shape index: {}]   ;;  %s3350_s7 = inlined_call_operand.hbm [shape: f32[1,32], index: 7, kind: input, shape index: {}]   ;;  %s3351_s8 = inlined_call_operand.hbm [shape: bf16[32,32], index: 8, kind: input, shape index: {}]   ;;  %s3352_s9 = inlined_call_operand.hbm [shape: f32[1,32], index: 9, kind: input, shape index: {}]   ;;  %s3353_s10 = inlined_call_operand.vmem [shape: f32[1,32], index: 10, kind: input, shape index: {}]   ;;  %s3354_s11 = inlined_call_operand.vmem [shape: f32[1,32], index: 11, kind: input, shape index: {}]   ;;  %s3355_s12 = inlined_call_operand.vmem [shape: bf16[32,128], index: 12, kind: input, shape index: {}]   ;;  %s3356_s13 = inlined_call_operand.vmem [shape: f32[1,128], index: 13, kind: input, shape index: {}]   ;;  %s3357_s14 = inlined_call_operand.vmem [shape: bf16[128,32], index: 14, kind: input, shape index: {}]   ;;  %s3358_s15 = inlined_call_operand.vmem [shape: f32[1,32], index: 15, kind: input, shape index: {}]   ;;  %s3359_s16 = inlined_call_operand.hbm [shape: f32[2,8,32], index: 16, kind: output, shape index: {}]  }
   0x1   :  { %3375 = sst [smem:[#allocation23_spill]] %s3343_s0 }
   0x2   :  { %3376 = sst [smem:[#allocation24_spill]] %s3356_s13 }
   0x3   :  { %3377 = sst [smem:[#allocation25_spill]] %s3358_s15 }
   0x4   :  { %3378 = sst [smem:[#allocation26_spill]] %s3359_s16 }
   0x5   :  { %21 = vsyncpa [#allocation5], 0 }
   0x6   :  { %22 = vsyncpa [#allocation8], 0 }
   0x7   :  { %23 = vsyncpa [#allocation6], 0 }
   0x8   :  { %25 = vsyncpa [#allocation6 + $0x1], 0  ;;  %s2873_s21 = smov 0   ;;  %s2875_s22 = smov 0  }
   0x9   :  { %s2877_s23 = smov 0   ;;  %s2879_s24 = smov 0  }
   0xa   :  { %s2881_s25 = smov 0   ;;  %s2883_s26 = smov 0  }
   0xb LB: > { %3379 = sst [smem:[#allocation14_spill]] %s2750_s21  ;;  %s2253_s27 = sadd.s32 4294967295, %s2770_s26   ;;  %s2770_s26 = sphi %s2883_s26, %s31_s26   ;;  %s2766_s25 = sphi %s2881_s25, %s3412_s25   ;;  %s2762_s24 = sphi %s2879_s24, %s3411_s24   ;;  %s2758_s23 = sphi %s2877_s23, %s3410_s23   ;;  %s2754_s22 = sphi %s2875_s22, %s3409_s22   ;;  %s2750_s21 = sphi %s2873_s21, %s3408_s21  }
   0xc   : > { %3380 = sst [smem:[#allocation15_spill]] %s2754_s22  ;;  %s2254_s28 = sadd.s32 4294967294, %s2770_s26  }
   0xd   : > { %3381 = sst [smem:[#allocation16_spill]] %s2758_s23  ;;  %s43_s29 = sadd.s32 1, %s2766_s25 }
   0xe   : > { %3382 = sst [smem:[#allocation17_spill]] %s2766_s25  ;;  %s400_s30 = sadd.s32 1, %s2758_s23 }
   0xf   : > { %3383 = sst [smem:[#allocation18_spill]] %s2770_s26  ;;  %p45_p0 = scmp.ge.s32.totalorder %s43_s29, 2 }
  0x10   : > { %p410_p1 = scmp.ne.s32.totalorder %s2758_s23, %s2754_s22  ;;  %p411_p2 = scmp.eq.s32.totalorder %s2253_s27, 1 }
  0x11   : > { %p416_p3 = scmp.ne.s32.totalorder %s2754_s22, %s2750_s21  ;;  %s3414_s29 = smov (%p45_p0, %s43_s29), 0 }
  0x12   : > { %3384 = sst [smem:[#allocation19_spill]] %s3414_s29  ;;  %p2913_p4 = por %p411_p2, %p410_p1 }
  0x13   : > { %p417_p5 = scmp.eq.s32.totalorder %s2254_s28, 1  ;;  %s395_s17 = ssub.s32 %s2766_s25, %s3414_s29 }
  0x14   : > { %s3385_s0 = scalar_select %p2913_p4, 1, 0 }
  0x15   : > { %p2255_p6 = scmp.ge.s32.totalorder %s2770_s26, 1  ;;  %p398_p7 = scmp.eq.s32.totalorder %s395_s17, 0 }
  0x16   : > { %3386 = sst [smem:[#allocation20_spill]] %s3385_s0  ;;  %p2920_p8 = por %p417_p5, %p416_p3 }
  0x17   : > { %p424_p9 = scmp.lt.s32.totalorder %s2770_s26, 3  ;;  %p2932_p11 = scmp.eq.s32.totalorder %s2253_s27, 0 }
  0x18   : > { %s3387_s18 = scalar_select %p2920_p8, 1, 0 }
  0x19   : > { %s2926_s19 = scalar_select %p398_p7, %s2758_s23, %s400_s30  }
  0x1a   : > { %3388 = sst [smem:[#allocation21_spill]] %s3387_s18  ;;  %p2928_p10 = pnand %p2255_p6, %p424_p9 }
  0x1b   : > { %3389 = sst [smem:[#allocation22_spill]] %s2926_s19  ;;  %s2772_s28 = smov [#allocation7]  }
  0x1c   : > { %s3390_s20 = scalar_select %p2928_p10, 1, 0 }
  0x1d   : > { %s3391_s21 = scalar_select %p2932_p11, 1, 0 }
  0x1e   : > { %p2480_p12 = pneg %p2928_p10  ;;  %s462_s17 = sshll.u32 %s2772_s28, 4  ;;  %s463_s17 = int_to_ptr.vmem [resolvable:$true] %s462_s17 }
  0x1f   : > { %s2773_s30 = smov [#allocation4]   ;;  %s2600_s27 = scalar_lea.hbm %s3351_s8, 256 }
  0x20   : > { %p2940_p13 = pnand %p2932_p11, %p2480_p12  ;;  %s452_s25 = sshll.u32 %s2773_s30, 4  ;;  %s453_s25 = int_to_ptr.vmem [resolvable:$true] %s452_s25 }
  0x21   : > { %p2601_p0 = scmp.ne.s32.totalorder %s3351_s8, %s2600_s27  ;;  %p2607_p5 = scmp.lt.u32.totalorder %s2600_s27, %s3351_s8 }
  0x22   : > { %p2952_p1 = pneg %p2940_p13 }
  0x24   : > { %p2603_p2 = pnand %p2952_p1, %p2601_p0 }
  0x26   : > { %p2604_p3 = pneg %p2603_p2 }
  0x28   : > { %p2609_p6 = pnand %p2607_p5, %p2604_p3 }
  0x2a   : > { %2612 = shalt.err (!%p2609_p6)
}
  0x2b   : > { %s2613_s23 = scalar_lea.vmem %s463_s17, 256  ;;  %p2621_p8 = scmp.lt.s32.totalorder %s463_s17, %s463_s17 }
  0x2c   : > { %p2614_p7 = scmp.ne.s32.totalorder %s463_s17, %s2613_s23  ;;  %p2622_p4 = scmp.lt.s32.totalorder %s2613_s23, %s2613_s23 }
  0x2e   : > { %p2616_p9 = pnand %p2614_p7, %p2952_p1  ;;  %p2623_p11 = por %p2622_p4, %p2621_p8 }
  0x30   : > { %p2617_p12 = pneg %p2616_p9 }
  0x32   : > { %p2624_p10 = pnand %p2623_p11, %p2617_p12 }
  0x34   : > { %2627 = shalt.err (!%p2624_p10)
}
  0x35   : > { %s2774_s26 = smov 64   ;;  %s2775_s18 = smov 4  }
  0x36   : > { %2486 = dma.hbm_to_vmem [thread:$0]  (!%p2940_p13), %s3351_s8, 256, %s463_s17, [#allocation8], %s2774_s26, %s2774_s26, %s2775_s18  }
  0x37   : > { %s2628_s27 = scalar_lea.hbm %s3350_s7, 16 }
  0x38   : > { %p2629_p4 = scmp.ne.s32.totalorder %s3350_s7, %s2628_s27  ;;  %p2635_p11 = scmp.lt.u32.totalorder %s2628_s27, %s3350_s7 }
  0x3a   : > { %p2631_p8 = pnand %p2629_p4, %p2952_p1 }
  0x3c   : > { %p2632_p10 = pneg %p2631_p8 }
  0x3e   : > { %p2637_p0 = pnand %p2635_p11, %p2632_p10 }
  0x40   : > { %2640 = shalt.err (!%p2637_p0)
}
  0x41   : > { %s2641_s16 = scalar_lea.vmem %s453_s25, 16  ;;  %s2648_s17 = scalar_lea.vmem %s453_s25, 32 }
  0x42   : > { %p2642_p2 = scmp.ne.s32.totalorder %s453_s25, %s2641_s16  ;;  %p2649_p6 = scmp.lt.s32.totalorder %s453_s25, %s453_s25 }
  0x43   : > { %p2650_p7 = scmp.lt.s32.totalorder %s2648_s17, %s2641_s16 }
  0x44   : > { %p2644_p3 = pnand %p2642_p2, %p2952_p1 }
  0x45   : > { %p2651_p9 = por %p2650_p7, %p2649_p6 }
  0x46   : > { %p2645_p5 = pneg %p2644_p3 }
  0x48   : > { %p2652_p12 = pnand %p2651_p9, %p2645_p5 }
  0x4a   : > { %2655 = shalt.err (!%p2652_p12)
}
  0x4b   : > { %2483 = dma.hbm_to_vmem [thread:$0]  (!%p2940_p13), %s3350_s7, 16, %s453_s25, [#allocation5]  }
  0x4c   : > { %s2776_s22 = smov [#allocation9]   ;;  %s2656_s19 = scalar_lea.hbm %s3352_s9, 16 }
  0x4d   : > { %s476_s26 = sshll.u32 %s2776_s22, 4  ;;  %p2657_p4 = scmp.ne.s32.totalorder %s3352_s9, %s2656_s19  ;;  %s477_s26 = int_to_ptr.vmem [resolvable:$true] %s476_s26 }
  0x4e   : > { %p2663_p11 = scmp.lt.u32.totalorder %s2656_s19, %s3352_s9 }
  0x4f   : > { %p2659_p8 = pnand %p2657_p4, %p2952_p1 }
  0x51   : > { %p2660_p10 = pneg %p2659_p8 }
  0x53   : > { %p2665_p0 = pnand %p2663_p11, %p2660_p10 }
  0x55   : > { %2668 = shalt.err (!%p2665_p0)
}
  0x56   : > { %s2669_s25 = scalar_lea.vmem %s477_s26, 16  ;;  %s2676_s17 = scalar_lea.vmem %s477_s26, 32 }
  0x57   : > { %p2670_p2 = scmp.ne.s32.totalorder %s477_s26, %s2669_s25  ;;  %p2677_p6 = scmp.lt.s32.totalorder %s477_s26, %s477_s26 }
  0x58   : > { %p2678_p7 = scmp.lt.s32.totalorder %s2676_s17, %s2669_s25 }
  0x59   : > { %p2672_p3 = pnand %p2670_p2, %p2952_p1 }
  0x5a   : > { %p2679_p9 = por %p2678_p7, %p2677_p6 }
  0x5b   : > { %p2673_p5 = pneg %p2672_p3 }
  0x5d   : > { %p2680_p12 = pnand %p2679_p9, %p2673_p5 }
  0x5f   : > { %2683 = shalt.err (!%p2680_p12)
}
  0x60   : > { %2489 = dma.hbm_to_vmem [thread:$0]  (!%p2940_p13), %s3352_s9, 16, %s477_s26, [#allocation8]  }
  0x61   : > { %p3394_p4 = scmp.ne.s32.totalorder %s3390_s20, 0 }
  0x62   : > { %p3395_p8 = scmp.ne.s32.totalorder (!%p3394_p4), %s3391_s21, 0 }
  0x63   : > { %524 = sbr.rel (%p3394_p4) target bundleno = 2362 (0x93a), region = 84 }
  0x6a   : > { %2737 = dma.done.wait (%p3395_p8), [#allocation5], 16  }
  0x6b   : > { %2739 = vsyncadd (%p3395_p8), [#allocation5], 4294967280 }
  0x6c   : > { %2741 = dma.done.wait (%p3395_p8), [#allocation8], 272  }
  0x6d   : > { %2743 = vsyncadd (%p3395_p8), [#allocation8], 4294967024  ;;  %p588_p1 = scmp.lt.s32.totalorder %s2762_s24, 1  ;;  %v2777_v0 = vmov 0.0   ;;  %vm2778_vm0 = vmmov 0   ;;  %s3396_s22 = sld [smem:[#allocation23_spill]]  ;;  %v751_v30 = vlaneseq }
  0x6e   : > { %2358 = vmatprep.subr.bf16.mxu0 %v2777_v0  ;;  %2362 = vmatprep.mubr.msk.bf16.mxu0 %vm2778_vm0, %v2777_v0  ;;  %v2564_v1 = vld [vmem:[%s3347_s4] sm:$0xff]   ;;  %v2565_v2 = vld [vmem:[%s3347_s4 + $0x8] sm:$0xff]   ;;  %vm629_vm1 = vcmask 261120   ;;  %s2779_s18 = smov 120   ;;  %s2780_s0 = smov 104   ;;  %vm886_vm2 = vcmask 60416  }
  0x6f   : > { %s589_s29 = scalar_select %p588_p1, %s2762_s24, 1  ;;  %2382 = vmatprep.subr.bf16.mxu1 %v2777_v0  ;;  %2384 = vmatprep.mubr.msk.bf16.mxu1 %vm2778_vm0, %v2777_v0  ;;  %v2566_v5 = vld [vmem:[%s3349_s6] sm:$0xff]   ;;  %v2567_v6 = vld [vmem:[%s3349_s6 + $0x8] sm:$0xff]   ;;  %v2782_v28 = vmov 1983009808   ;;  %v752_v34 = vshrl.u32 %v751_v30, 7 }
  0x70   : > { %2359 = vmatpush3.bf16.msra.mxu0 %v2564_v1  ;;  %v2568_v7 = vld [vmem:[%s3345_s2] sm:$0xff]   ;;  %v2569_v9 = vld [vmem:[%s3345_s2 + $0x8] sm:$0xff]   ;;  %s2781_s19 = smov 112   ;;  %v749_v29 = vunpack.c.l.s4 %v2782_v28  ;;  %v2783_v31 = vmov 1934713408   ;;  %vm1269_vm3 = vcmask 64512  }
  0x71   : > { %s2265_s20 = sshll.u32 %s589_s29, 3  ;;  %2360 = vmatprep.subr.bf16.mxu0 %v2777_v0  ;;  %v2267_v11 = vld [vmem:[%s3348_s5] ss:$0 sm:$0xff]  ;;  %v781_v32 = vunpack.c.l.s4 %v2783_v31  ;;  %vm1509_vm4 = vcmask 1043456   ;;  %s2784_s23 = smov 16   ;;  %vm1840_vm5 = vcmask 130048  }
  0x72   : > { %s598_s28 = scalar_lea.vmem %s3344_s1, %s2265_s20  ;;  %v2279_v21 = vld [vmem:[%s3346_s3] ss:$0 sm:$0xff]  ;;  %v750_v33 = vunpack.c.0.s8 %v749_v29  ;;  %s2785_s16 = smov 8   ;;  %vm1842_vm6 = vcmask 195584  }
  0x73   : > { %s591_s26 = scalar_lea.vmem %s3396_s22, %s2265_s20  ;;  %v3051_v8 = vld [vmem:[%s598_s28] sm:$0xff]  ;;  %v782_v37 = vunpack.c.0.s8 %v781_v32  ;;  %s2786_s25 = smov 24  }
  0x74   : > { %v604_v3 = vld [vmem:[%s591_s26] sm:$0xff]  ;;  %2361 = vmatpush3.bf16.msra.mxu0 %v2565_v2  ;;  %v1046_v10 = vpack.c.bf16 %v3051_v8, %v3051_v8  ;;  %v3084_v38 = vsub.s32 %v750_v33, %v752_v34  ;;  %s3397_s29 = sld [smem:[#allocation15_spill]]  ;;  %s2315_s17 = sshll.u32 %s2762_s24, 7 }
  0x75   : > { %v605_v4 = vpack.c.bf16 %v604_v3, %v604_v3  ;;  %2366 = vmatprep.subr.bf16.mxu0 %v2777_v0  ;;  %v3086_v44 = vsub.s32 %v782_v37, %v752_v34  ;;  %s3401_s22 = sld [smem:[#allocation26_spill]] }
  0x77   : > { %2363 = vmatmul.mubr.msk.bf16.vlgmr.msra.gmra.mrb[0].mxu0 %vm629_vm1, %v605_v4 }
  0x78   : > { %2367 = vmatpush3.bf16.msra.mxu0 %v2566_v5  ;;  %2370 = vmatprep.mubr.msk.bf16.mxu0 %vm2778_vm0, %v2777_v0 }
  0x79   : > { %2368 = vmatprep.subr.bf16.mxu0 %v2777_v0 }
  0x7b   : > { %s3402_s20 = smov %s3401_s22  ;;  %s3295_s26 = scalar_lea.hbm %s3401_s22, %s2315_s17 }
  0x7c   : > { %2369 = vmatpush3.bf16.msra.mxu0 %v2567_v6 }
  0x7d   : > { %2374 = vmatprep.subr.bf16.mxu0 %v2777_v0 }
  0x7f   : > { %2371 = vmatmul.mubr.msk.bf16.vlgmr.msra.gmra.mrb[4].mxu0 %vm629_vm1, %v605_v4 }
  0x80   : > { %2375 = vmatpush3.bf16.msra.mxu0 %v2568_v7  ;;  %2378 = vmatprep.mubr.msk.bf16.mxu0 %vm2778_vm0, %v2777_v0 }
  0x81   : > { %2376 = vmatprep.subr.bf16.mxu0 %v2777_v0 }
  0x84   : > { %2377 = vmatpush3.bf16.msra.mxu0 %v2569_v9 }
  0x85   : > { %2388 = vmatprep.subr.bf16.mxu0 %v2777_v0 }
  0x87   : > { %2379 = vmatmul.mubr.msk.bf16.vlgmr.msra.gmra.mrb[8].mxu0 %vm629_vm1, %v1046_v10 }
  0x88   : > { %2390 = vmatprep.mubr.msk.bf16.mxu0 %vm2778_vm0, %v2777_v0 }
 0x14a   : > { %v667_v12 = vpop.f32.mrb[0].mxu0 }
 0x14b   : > { %v668_v13 = vadd.f32 %v2267_v11, %v667_v12  ;;  %v2364_v14 = vpop.f32.mrb[1].mxu0 }
 0x14c   : > { %v670_v15 = vpop.f32.mrb[2].mxu0 }
 0x14d   : > { %737 = vrot.lane.b32.xlu0 %v668_v13, %s2779_s18  ;;  %v2365_v16 = vpop.f32.mrb[3].mxu0  ;;  %743 = vrot.lane.b32.xlu1 %v668_v13, %s2780_s0 }
 0x151   : > { %740 = vrot.lane.b32.xlu0 %v668_v13, %s2781_s19 }
 0x152   : > { %v3071_v17 = vpop.f32.mrb[4].mxu0 }
 0x153   : > { %v2372_v18 = vpop.f32.mrb[5].mxu0 }
 0x154   : > { %v733_v19 = vpop.f32.mrb[6].mxu0 }
 0x155   : > { %v2373_v20 = vpop.f32.mrb[7].mxu0 }
 0x15a   : > { %v1108_v22 = vpop.f32.mrb[8].mxu0 }
 0x15b   : > { %v1109_v23 = vadd.f32 %v2279_v21, %v1108_v22  ;;  %v2380_v24 = vpop.f32.mrb[9].mxu0 }
 0x15c   : > { %v1111_v25 = vpop.f32.mrb[10].mxu0 }
 0x15d   : > { %v3076_v26 = vmul.f32 0.35355338, %v1109_v23  ;;  %v2381_v27 = vpop.f32.mrb[11].mxu0 }
 0x15f   : > { %1119 = vrot.lane.b32.xlu0 %v3076_v26, %s2781_s19  ;;  %1116 = vrot.lane.b32.xlu1 %v3076_v26, %s2779_s18 }
 0x163   : > { %1122 = vrot.lane.b32.xlu1 %v3076_v26, %s2780_s0 }
 0x1bf   : > { %v738_v35 = vpop.permute.xlu0 %737  ;;  %v744_v36 = vpop.permute.xlu1 %743 }
 0x1c0   : > { %v762_v39 = vcombine.low %v738_v35, %v744_v36  ;;  %v763_v40 = vcombine.high %v738_v35, %v744_v36 }
 0x1c2   : > { %v770_v45 = vrot.slane %v762_v39, %v3084_v38  ;;  %v777_v46 = vrot.slane %v763_v40, %v3084_v38 }
 0x1c3   : > { %v741_v41 = vpop.permute.xlu0 %740 }
 0x1c4   : > { %v746_v42 = vcombine.low %v668_v13, %v741_v41  ;;  %v747_v43 = vcombine.high %v668_v13, %v741_v41 }
 0x1c6   : > { %v754_v47 = vrot.slane %v746_v42, %v3084_v38  ;;  %v761_v48 = vrot.slane %v747_v43, %v3084_v38 }
 0x1c8   : > { %v778_v49 = vcombine.low %v754_v47, %v770_v45  ;;  %v779_v50 = vcombine.high %v754_v47, %v770_v45  ;;  %v794_v51 = vcombine.low %v761_v48, %v777_v46  ;;  %v795_v52 = vcombine.high %v761_v48, %v777_v46 }
 0x1ca   : > { %v786_v53 = vrot.slane %v778_v49, %v3086_v44  ;;  %v793_v54 = vrot.slane %v779_v50, %v3086_v44  ;;  %v802_v55 = vrot.slane %v794_v51, %v3086_v44  ;;  %v809_v56 = vrot.slane %v795_v52, %v3086_v44 }
 0x1cc   : > { %v814_v57 = vcombine.low %v786_v53, %v793_v54  ;;  %v2275_v58 = vcombine.high %v786_v53, %v793_v54  ;;  %v830_v59 = vcombine.low %v802_v55, %v809_v56  ;;  %v2276_v60 = vcombine.high %v802_v55, %v809_v56 }
 0x1ce   : > { %v821_v61 = vrot.slane %v814_v57, %v3084_v38  ;;  %v829_v62 = vrot.slane %v2275_v58, %v3084_v38  ;;  %v837_v63 = vrot.slane %v830_v59, %v3084_v38  ;;  %v845_v1 = vrot.slane %v2276_v60, %v3084_v38 }
 0x1d0   : > { %v846_v2 = vcombine.low %v821_v61, %v829_v62  ;;  %v847_v3 = vcombine.high %v821_v61, %v829_v62  ;;  %v862_v4 = vcombine.low %v837_v63, %v845_v1  ;;  %v863_v5 = vcombine.high %v837_v63, %v845_v1 }
 0x1d1   : > { %v1117_v6 = vpop.permute.xlu1 %1116  ;;  %v1120_v12 = vpop.permute.xlu0 %1119 }
 0x1d2   : > { %v854_v7 = vrot.slane %v846_v2, %v3086_v44  ;;  %v861_v9 = vrot.slane %v847_v3, %v3086_v44  ;;  %v870_v10 = vrot.slane %v862_v4, %v3086_v44  ;;  %v877_v11 = vrot.slane %v863_v5, %v3086_v44 }
 0x1d3   : > { %v1125_v18 = vcombine.low %v3076_v26, %v1120_v12  ;;  %v1126_v19 = vcombine.high %v3076_v26, %v1120_v12 }
 0x1d4   : > { %v878_v13 = vcombine.low %v854_v7, %v870_v10  ;;  %v879_v14 = vcombine.high %v854_v7, %v870_v10  ;;  %v880_v15 = vcombine.low %v861_v9, %v877_v11  ;;  %v881_v16 = vcombine.high %v861_v9, %v877_v11 }
 0x1d5   : > { %v1123_v20 = vpop.permute.xlu1 %1122  ;;  %v1133_v28 = vrot.slane %v1125_v18, %v3084_v38  ;;  %v1140_v29 = vrot.slane %v1126_v19, %v3084_v38 }
 0x1d6   : > { %v882_v21 = vpack.c.bf16 %v878_v13, %v878_v13  ;;  %v883_v22 = vpack.c.bf16 %v879_v14, %v879_v14  ;;  %v884_v23 = vpack.c.bf16 %v880_v15, %v880_v15  ;;  %v885_v24 = vpack.c.bf16 %v881_v16, %v881_v16 }
 0x1d7   : > { %v1141_v25 = vcombine.low %v1117_v6, %v1123_v20  ;;  %v1142_v27 = vcombine.high %v1117_v6, %v1123_v20 }
 0x1d8   : > { %887 = vst.msk [vmem:[#allocation2] sm:$0xf] %vm886_vm2, %v882_v21  ;;  %888 = vst.msk [vmem:[#allocation2 + $0x4] sm:$0xf] %vm886_vm2, %v883_v22 }
 0x1d9   : > { %889 = vst.msk [vmem:[#allocation2 + $0x8] sm:$0xf] %vm886_vm2, %v884_v23  ;;  %890 = vst.msk [vmem:[#allocation2 + $0xc] sm:$0xf] %vm886_vm2, %v885_v24  ;;  %v1149_v26 = vrot.slane %v1141_v25, %v3084_v38  ;;  %v1156_v30 = vrot.slane %v1142_v27, %v3084_v38 }
 0x1db   : > { %v1157_v31 = vcombine.low %v1133_v28, %v1149_v26  ;;  %v1158_v32 = vcombine.high %v1133_v28, %v1149_v26  ;;  %v1173_v33 = vcombine.low %v1140_v29, %v1156_v30  ;;  %v1174_v34 = vcombine.high %v1140_v29, %v1156_v30 }
 0x1dd   : > { %v1165_v35 = vrot.slane %v1157_v31, %v3086_v44  ;;  %v1172_v36 = vrot.slane %v1158_v32, %v3086_v44  ;;  %v1181_v37 = vrot.slane %v1173_v33, %v3086_v44  ;;  %v1188_v39 = vrot.slane %v1174_v34, %v3086_v44  ;;  %v2271_v32 = vld [vmem:[#allocation4] ss:$0 sm:$0xff] }
 0x1de   : > { %v731_v33 = vadd.f32 %v2271_v32, %v3071_v17 }
 0x1df   : > { %v1193_v40 = vcombine.low %v1165_v35, %v1172_v36  ;;  %v2283_v41 = vcombine.high %v1165_v35, %v1172_v36  ;;  %v1209_v42 = vcombine.low %v1181_v37, %v1188_v39  ;;  %v2284_v43 = vcombine.high %v1181_v37, %v1188_v39  ;;  %v1265_v45 = vld [vmem:[#allocation2] sm:$0xf]  ;;  %v1266_v46 = vld [vmem:[#allocation2 + $0x4] sm:$0xf] }
 0x1e0   : > { %v1274_v47 = vsel %vm1269_vm3, %v1265_v45, 0  ;;  %v1320_v48 = vsel %vm1269_vm3, %v1266_v46, 0  ;;  %v1267_v61 = vld [vmem:[#allocation2 + $0x8] sm:$0xf]  ;;  %v1268_v62 = vld [vmem:[#allocation2 + $0xc] sm:$0xf] }
 0x1e1   : > { %v1200_v49 = vrot.slane %v1193_v40, %v3084_v38  ;;  %v1208_v50 = vrot.slane %v2283_v41, %v3084_v38  ;;  %v1216_v51 = vrot.slane %v1209_v42, %v3084_v38  ;;  %v1224_v52 = vrot.slane %v2284_v43, %v3084_v38  ;;  %2383 = vmatpush3.bf16.xpose.msra.mxu1 %v1274_v47 }
 0x1e2   : > { %2389 = vmatpush3.bf16.xpose.msra.mxu0 %v1320_v48  ;;  %2394 = vmatprep.subr.bf16.mxu1 %v2777_v0  ;;  %v1366_v4 = vsel %vm1269_vm3, %v1267_v61, 0  ;;  %v1412_v5 = vsel %vm1269_vm3, %v1268_v62, 0 }
 0x1e3   : > { %2400 = vmatprep.subr.bf16.mxu0 %v2777_v0  ;;  %v1225_v53 = vcombine.low %v1200_v49, %v1208_v50  ;;  %v1241_v54 = vcombine.low %v1216_v51, %v1224_v52  ;;  %v1226_v55 = vcombine.high %v1200_v49, %v1208_v50  ;;  %v1242_v56 = vcombine.high %v1216_v51, %v1224_v52 }
 0x1e5   : > { %v1233_v57 = vrot.slane %v1225_v53, %v3086_v44  ;;  %v1249_v58 = vrot.slane %v1241_v54, %v3086_v44  ;;  %v1240_v2 = vrot.slane %v1226_v55, %v3086_v44  ;;  %v1256_v3 = vrot.slane %v1242_v56, %v3086_v44 }
 0x1e7   : > { %v1257_v59 = vcombine.low %v1233_v57, %v1249_v58  ;;  %v1258_v60 = vcombine.high %v1233_v57, %v1249_v58  ;;  %v1259_v6 = vcombine.low %v1240_v2, %v1256_v3  ;;  %v1260_v7 = vcombine.high %v1240_v2, %v1256_v3 }
 0x1e9   : > { %v1261_v63 = vpack.c.bf16 %v1257_v59, %v1257_v59  ;;  %v1262_v1 = vpack.c.bf16 %v1258_v60, %v1258_v60  ;;  %v1263_v9 = vpack.c.bf16 %v1259_v6, %v1259_v6  ;;  %v1264_v10 = vpack.c.bf16 %v1260_v7, %v1260_v7 }
 0x1eb   : > { %2385 = vmatmul.mubr.msk.bf16.vlgmr.msra.gmra.mrb[0].mxu1 %vm1269_vm3, %v1261_v63  ;;  %2391 = vmatmul.mubr.msk.bf16.vlgmr.msra.gmra.mrb[12].mxu0 %vm1269_vm3, %v1262_v1 }
 0x1ec   : > { %2395 = vmatpush3.bf16.xpose.msra.mxu1 %v1366_v4  ;;  %2401 = vmatpush3.bf16.xpose.msra.mxu0 %v1412_v5 }
 0x1ed   : > { %2396 = vmatprep.mubr.msk.bf16.mxu1 %vm2778_vm0, %v2777_v0  ;;  %2402 = vmatprep.mubr.msk.bf16.mxu0 %vm2778_vm0, %v2777_v0 }
 0x1ee   : > { %2406 = vmatprep.subr.bf16.mxu1 %v2777_v0  ;;  %2412 = vmatprep.subr.bf16.mxu0 %v2777_v0 }
 0x1f3   : > { %2397 = vmatmul.mubr.msk.bf16.vlgmr.msra.gmra.mrb[4].mxu1 %vm1269_vm3, %v1263_v9  ;;  %2403 = vmatmul.mubr.msk.bf16.vlgmr.msra.gmra.mrb[16].mxu0 %vm1269_vm3, %v1264_v10 }
 0x1f4   : > { %2408 = vmatprep.mubr.msk.bf16.mxu1 %vm2778_vm0, %v2777_v0  ;;  %2414 = vmatprep.mubr.msk.bf16.mxu0 %vm2778_vm0, %v2777_v0 }
 0x2be   : > { %v1310_v11 = vpop.f32.mrb[0].mxu1  ;;  %v1356_v12 = vpop.f32.mrb[12].mxu0 }
 0x2bf   : > { %v2386_v13 = vpop.f32.mrb[1].mxu1  ;;  %v2392_v14 = vpop.f32.mrb[13].mxu0  ;;  %v1454_v15 = vsel %vm1269_vm3, %v1310_v11, -inf  ;;  %v1457_v16 = vsel %vm1269_vm3, %v1356_v12, -inf }
 0x2c0   : > { %1455 = vmax.xlane.f32.xlu0 %v1454_v15  ;;  %v1313_v18 = vpop.f32.mrb[2].mxu1  ;;  %1458 = vmax.xlane.f32.xlu1 %v1457_v16  ;;  %v1359_v19 = vpop.f32.mrb[14].mxu0 }
 0x2c1   : > { %v2387_v20 = vpop.f32.mrb[3].mxu1  ;;  %v2393_v21 = vpop.f32.mrb[15].mxu0 }
 0x2c6   : > { %v1402_v22 = vpop.f32.mrb[4].mxu1  ;;  %v1448_v23 = vpop.f32.mrb[16].mxu0 }
 0x2c7   : > { %v2398_v24 = vpop.f32.mrb[5].mxu1  ;;  %v2404_v25 = vpop.f32.mrb[17].mxu0  ;;  %v1460_v27 = vsel %vm1269_vm3, %v1402_v22, -inf  ;;  %v1463_v31 = vsel %vm1269_vm3, %v1448_v23, -inf }
 0x2c8   : > { %1461 = vmax.xlane.f32.xlu0 %v1460_v27  ;;  %v1405_v28 = vpop.f32.mrb[6].mxu1  ;;  %v1451_v29 = vpop.f32.mrb[18].mxu0 }
 0x2c9   : > { %v2399_v26 = vpop.f32.mrb[7].mxu1  ;;  %v2405_v30 = vpop.f32.mrb[19].mxu0 }
 0x2cc   : > { %1464 = vmax.xlane.f32.xlu0 %v1463_v31 }
 0x2d1   : > { %892 = vrot.lane.b32.xlu1 %v731_v33, %s2779_s18  ;;  %s2787_s18 = smov [#allocation10]  }
 0x2d5   : > { %898 = vrot.lane.b32.xlu1 %v731_v33, %s2780_s0  ;;  %s3398_s0 = sld [smem:[#allocation24_spill]] }
 0x2e2   : > { %895 = vrot.lane.b32.xlu0 %v731_v33, %s2781_s19  ;;  %s585_s19 = sand.u32 1, %s3397_s29  }
 0x2e3   : > { %s2264_s30 = sshll.u32 %s585_s19, 3  ;;  %s2125_s24 = scalar_lea.sflag [#allocation6], %s585_s19 }
 0x2e4   : > { %s587_s13 = scalar_lea.vmem [#allocation10], %s2264_s30 }
 0x2e5   : > { %s2139_s15 = sshll.u32 %s587_s13, 4  ;;  %s3297_s15 = int_to_ptr.vmem [resolvable:$true] %s2139_s15 }
 0x2e6   : > { %s2684_s29 = scalar_lea.vmem %s3297_s15, 128 }
 0x2e7   : > { %p2685_p13 = scmp.ne.s32.totalorder %s3297_s15, %s2684_s29 }
 0x34d   : > { %v1456_v34 = vpop.xlane.xlu0 %1455  ;;  %v1459_v35 = vpop.xlane.xlu1 %1458 }
 0x34e   : > { %v1466_v36 = vsub.f32 %v1310_v11, %v1456_v34  ;;  %v1467_v37 = vsub.f32 %v1356_v12, %v1459_v35 }
 0x350   : > { %v1470_v39 = vmul.f32 1.442695, %v1466_v36  ;;  %v1472_v40 = vmul.f32 1.442695, %v1467_v37 }
 0x351   : > { %v893_v41 = vpop.permute.xlu1 %892 }
 0x352   : > { %2582 = vpow2.f32 %v1470_v39 }
 0x353   : > { %2584 = vpow2.f32 %v1472_v40 }
 0x355   : > { %v1462_v42 = vpop.xlane.xlu0 %1461  ;;  %v899_v46 = vpop.permute.xlu1 %898 }
 0x356   : > { %v1468_v43 = vsub.f32 %v1402_v22, %v1462_v42  ;;  %v917_v49 = vcombine.low %v893_v41, %v899_v46  ;;  %v918_v50 = vcombine.high %v893_v41, %v899_v46 }
 0x358   : > { %v1474_v45 = vmul.f32 1.442695, %v1468_v43  ;;  %v925_v58 = vrot.slane %v917_v49, %v3084_v38  ;;  %v932_v59 = vrot.slane %v918_v50, %v3084_v38 }
 0x359   : > { %v1465_v17 = vpop.xlane.xlu0 %1464 }
 0x35a   : > { %2586 = vpow2.f32 %v1474_v45  ;;  %v1469_v47 = vsub.f32 %v1448_v23, %v1465_v17 }
 0x35c   : > { %v3154_v48 = vpop.eup %2582  ;;  %v1476_v51 = vmul.f32 1.442695, %v1469_v47 }
 0x35d   : > { %v3156_v52 = vpop.eup %2584  ;;  %v896_v53 = vpop.permute.xlu0 %895  ;;  %v1478_v54 = vsel %vm1269_vm3, %v3154_v48, 0.0 }
 0x35e   : > { %2588 = vpow2.f32 %v1476_v51  ;;  %v901_v55 = vcombine.low %v731_v33, %v896_v53  ;;  %v902_v56 = vcombine.high %v731_v33, %v896_v53  ;;  %1479 = vadd.xlane.f32.xlu1 %v1478_v54  ;;  %v1481_v57 = vsel %vm1269_vm3, %v3156_v52, 0.0 }
 0x35f   : > { %1482 = vadd.xlane.f32.xlu0 %v1481_v57 }
 0x360   : > { %v909_v60 = vrot.slane %v901_v55, %v3084_v38  ;;  %v916_v61 = vrot.slane %v902_v56, %v3084_v38 }
 0x362   : > { %v933_v62 = vcombine.low %v909_v60, %v925_v58  ;;  %v934_v63 = vcombine.high %v909_v60, %v925_v58  ;;  %v949_v1 = vcombine.low %v916_v61, %v932_v59  ;;  %v950_v2 = vcombine.high %v916_v61, %v932_v59 }
 0x364   : > { %v3166_v3 = vpop.eup %2586  ;;  %v941_v4 = vrot.slane %v933_v62, %v3086_v44  ;;  %v948_v5 = vrot.slane %v934_v63, %v3086_v44  ;;  %v957_v6 = vrot.slane %v949_v1, %v3086_v44  ;;  %v964_v7 = vrot.slane %v950_v2, %v3086_v44 }
 0x365   : > { %v1484_v9 = vsel %vm1269_vm3, %v3166_v3, 0.0 }
 0x366   : > { %v969_v10 = vcombine.low %v941_v4, %v948_v5  ;;  %v2277_v11 = vcombine.high %v941_v4, %v948_v5  ;;  %v985_v12 = vcombine.low %v957_v6, %v964_v7  ;;  %v2278_v13 = vcombine.high %v957_v6, %v964_v7  ;;  %1485 = vadd.xlane.f32.xlu0 %v1484_v9 }
 0x368   : > { %v3174_v14 = vpop.eup %2588  ;;  %v976_v15 = vrot.slane %v969_v10, %v3084_v38  ;;  %v984_v16 = vrot.slane %v2277_v11, %v3084_v38  ;;  %v992_v18 = vrot.slane %v985_v12, %v3084_v38  ;;  %v1000_v19 = vrot.slane %v2278_v13, %v3084_v38 }
 0x369   : > { %v1487_v20 = vsel %vm1269_vm3, %v3174_v14, 0.0 }
 0x36a   : > { %v1001_v21 = vcombine.low %v976_v15, %v984_v16  ;;  %v1002_v22 = vcombine.high %v976_v15, %v984_v16  ;;  %v1017_v23 = vcombine.low %v992_v18, %v1000_v19  ;;  %v1018_v24 = vcombine.high %v992_v18, %v1000_v19  ;;  %1488 = vadd.xlane.f32.xlu1 %v1487_v20 }
 0x36c   : > { %v1009_v25 = vrot.slane %v1001_v21, %v3086_v44  ;;  %v1016_v27 = vrot.slane %v1002_v22, %v3086_v44  ;;  %v1025_v28 = vrot.slane %v1017_v23, %v3086_v44  ;;  %v1032_v29 = vrot.slane %v1018_v24, %v3086_v44 }
 0x36e   : > { %v1033_v26 = vcombine.low %v1009_v25, %v1025_v28  ;;  %v1034_v30 = vcombine.high %v1009_v25, %v1025_v28  ;;  %v1035_v31 = vcombine.low %v1016_v27, %v1032_v29  ;;  %v1036_v32 = vcombine.high %v1016_v27, %v1032_v29 }
 0x370   : > { %v1037_v33 = vpack.c.bf16 %v1033_v26, %v1033_v26  ;;  %v1038_v34 = vpack.c.bf16 %v1034_v30, %v1034_v30  ;;  %v1039_v35 = vpack.c.bf16 %v1035_v31, %v1035_v31  ;;  %v1040_v36 = vpack.c.bf16 %v1036_v32, %v1036_v32  ;;  %v2570_v26 = vld [vmem:[#allocation7] sm:$0xff]  }
 0x372   : > { %1041 = vst.msk [vmem:[#allocation3] sm:$0xf] %vm886_vm2, %v1037_v33  ;;  %1042 = vst.msk [vmem:[#allocation3 + $0x4] sm:$0xf] %vm886_vm2, %v1038_v34 }
 0x373   : > { %1043 = vst.msk [vmem:[#allocation3 + $0x8] sm:$0xf] %vm886_vm2, %v1039_v35  ;;  %1044 = vst.msk [vmem:[#allocation3 + $0xc] sm:$0xf] %vm886_vm2, %v1040_v36 }
 0x379   : > { %v1502_v37 = vld [vmem:[#allocation3] sm:$0xf]  ;;  %v1503_v39 = vld [vmem:[#allocation3 + $0x4] sm:$0xf] }
 0x37a   : > { %v1511_v40 = vsel %vm1509_vm4, %v1502_v37, 0  ;;  %v1557_v41 = vsel %vm1509_vm4, %v1503_v39, 0  ;;  %v1504_v51 = vld [vmem:[#allocation3 + $0x8] sm:$0xf]  ;;  %v1505_v54 = vld [vmem:[#allocation3 + $0xc] sm:$0xf] }
 0x37b   : > { %2407 = vmatpush3.bf16.msra.mxu1 %v1511_v40  ;;  %2413 = vmatpush3.bf16.msra.mxu0 %v1557_v41  ;;  %v1603_v56 = vsel %vm1509_vm4, %v1504_v51, 0  ;;  %v1649_v57 = vsel %vm1509_vm4, %v1505_v54, 0  ;;  %v2571_v39 = vld [vmem:[#allocation7 + $0x8] sm:$0xff]  }
 0x37c   : > { %2418 = vmatprep.subr.bf16.mxu1 %v2777_v0  ;;  %2424 = vmatprep.subr.bf16.mxu0 %v2777_v0 }
 0x3eb   : > { %v1480_v42 = vpop.xlane.xlu1 %1479 }
 0x3ec   : > { %2590 = vrcp.f32 %v1480_v42  ;;  %v1483_v43 = vpop.xlane.xlu0 %1482 }
 0x3ed   : > { %2592 = vrcp.f32 %v1483_v43 }
 0x3f3   : > { %v1486_v45 = vpop.xlane.xlu0 %1485 }
 0x3f4   : > { %2594 = vrcp.f32 %v1486_v45 }
 0x3f6   : > { %v2591_v46 = vpop.eup %2590 }
 0x3f7   : > { %v2593_v17 = vpop.eup %2592  ;;  %v1494_v47 = vmul.f32 %v2591_v46, %v3154_v48  ;;  %v1489_v49 = vpop.xlane.xlu1 %1488 }
 0x3f8   : > { %v1495_v50 = vmul.f32 %v2593_v17, %v3156_v52  ;;  %2596 = vrcp.f32 %v1489_v49 }
 0x3f9   : > { %v1498_v53 = vpack.c.bf16 %v1494_v47, %v1494_v47 }
 0x3fa   : > { %v1499_v55 = vpack.c.bf16 %v1495_v50, %v1495_v50 }
 0x3fb   : > { %2409 = vmatmul.mubr.msk.bf16.vlgmr.msra.gmra.mrb[8].mxu1 %vm1269_vm3, %v1498_v53 }
 0x3fc   : > { %2415 = vmatmul.mubr.msk.bf16.vlgmr.msra.gmra.mrb[20].mxu0 %vm1269_vm3, %v1499_v55  ;;  %2419 = vmatpush3.bf16.msra.mxu1 %v1603_v56 }
 0x3fd   : > { %2425 = vmatpush3.bf16.msra.mxu0 %v1649_v57  ;;  %2420 = vmatprep.mubr.msk.bf16.mxu1 %vm2778_vm0, %v2777_v0 }
 0x3fe   : > { %v2595_v48 = vpop.eup %2594  ;;  %2426 = vmatprep.mubr.msk.bf16.mxu0 %vm2778_vm0, %v2777_v0  ;;  %2430 = vmatprep.subr.bf16.mxu1 %v2777_v0 }
 0x3ff   : > { %v1496_v52 = vmul.f32 %v2595_v48, %v3166_v3  ;;  %2438 = vmatprep.subr.bf16.mxu0 %v2777_v0 }
 0x401   : > { %v1500_v58 = vpack.c.bf16 %v1496_v52, %v1496_v52 }
 0x402   : > { %v2597_v59 = vpop.eup %2596 }
 0x403   : > { %v1497_v60 = vmul.f32 %v2597_v59, %v3174_v14  ;;  %2421 = vmatmul.mubr.msk.bf16.vlgmr.msra.gmra.mrb[12].mxu1 %vm1269_vm3, %v1500_v58 }
 0x404   : > { %2434 = vmatprep.mubr.msk.bf16.mxu1 %vm2778_vm0, %v2777_v0  ;;  %2431 = vmatpush3.bf16.msra.mxu1 %v2570_v26 }
 0x405   : > { %v1501_v61 = vpack.c.bf16 %v1497_v60, %v1497_v60  ;;  %2432 = vmatprep.subr.bf16.mxu1 %v2777_v0 }
 0x407   : > { %2427 = vmatmul.mubr.msk.bf16.vlgmr.msra.gmra.mrb[24].mxu0 %vm1269_vm3, %v1501_v61  ;;  %v2295_v61 = vld [vmem:[#allocation9] ss:$0 sm:$0xff] }
 0x408   : > { %2442 = vmatprep.mubr.msk.bf16.mxu0 %vm2778_vm0, %v2777_v0  ;;  %2433 = vmatpush3.bf16.msra.mxu1 %v2571_v39 }
 0x409   : > { %2446 = vmatprep.subr.bf16.mxu1 %v2777_v0 }
 0x4ce   : > { %v1547_v62 = vpop.f32.mrb[8].mxu1 }
 0x4cf   : > { %v1593_v63 = vpop.f32.mrb[20].mxu0  ;;  %v2410_v1 = vpop.f32.mrb[9].mxu1 }
 0x4d0   : > { %v2416_v2 = vpop.f32.mrb[21].mxu0  ;;  %v1550_v3 = vpop.f32.mrb[10].mxu1 }
 0x4d1   : > { %v1596_v4 = vpop.f32.mrb[22].mxu0  ;;  %v2411_v5 = vpop.f32.mrb[11].mxu1 }
 0x4d2   : > { %v2417_v6 = vpop.f32.mrb[23].mxu0 }
 0x4d6   : > { %v1639_v7 = vpop.f32.mrb[12].mxu1 }
 0x4d7   : > { %v1691_v9 = vcombine.low %v1547_v62, %v1639_v7  ;;  %v1692_v10 = vcombine.high %v1547_v62, %v1639_v7  ;;  %v2422_v11 = vpop.f32.mrb[13].mxu1 }
 0x4d8   : > { %v1642_v12 = vpop.f32.mrb[14].mxu1 }
 0x4d9   : > { %v2423_v13 = vpop.f32.mrb[15].mxu1  ;;  %v1699_v20 = vrot.slane %v1691_v9, %v3084_v38  ;;  %v1706_v21 = vrot.slane %v1692_v10, %v3084_v38  ;;  %v2572_v12 = vld [vmem:[%s3355_s12] sm:$0xff]  }
 0x4da   : > { %v1685_v14 = vpop.f32.mrb[24].mxu0  ;;  %2439 = vmatpush3.bf16.msra.mxu0 %v2572_v12  ;;  %v2573_v13 = vld [vmem:[%s3355_s12 + $0x8] sm:$0xff]  }
 0x4db   : > { %v1707_v15 = vcombine.low %v1593_v63, %v1685_v14  ;;  %v1708_v16 = vcombine.high %v1593_v63, %v1685_v14  ;;  %v2428_v18 = vpop.f32.mrb[25].mxu0  ;;  %2440 = vmatprep.subr.bf16.mxu0 %v2777_v0  ;;  %v2575_v14 = vld [vmem:[%s3357_s14 + $0x8] sm:$0xff]  }
 0x4dc   : > { %v1688_v19 = vpop.f32.mrb[26].mxu0  ;;  %v2578_v18 = vld [vmem:[%s3357_s14 + $0x20] sm:$0xff]  }
 0x4dd   : > { %v1715_v22 = vrot.slane %v1707_v15, %v3084_v38  ;;  %v1722_v23 = vrot.slane %v1708_v16, %v3084_v38  ;;  %v2429_v24 = vpop.f32.mrb[27].mxu0  ;;  %v2576_v15 = vld [vmem:[%s3357_s14 + $0x10] sm:$0xff]   ;;  %v2577_v16 = vld [vmem:[%s3357_s14 + $0x18] sm:$0xff]   ;;  %v2579_v19 = vld [vmem:[%s3357_s14 + $0x28] sm:$0xff]  }
 0x4de   : > { %2441 = vmatpush3.bf16.msra.mxu0 %v2573_v13  ;;  %v2299_v24 = vld [vmem:[%s3353_s10] ss:$0 sm:$0xff] }
 0x4df   : > { %v1723_v25 = vcombine.low %v1699_v20, %v1715_v22  ;;  %v1724_v27 = vcombine.high %v1699_v20, %v1715_v22  ;;  %v1739_v28 = vcombine.low %v1706_v21, %v1722_v23  ;;  %v1740_v29 = vcombine.high %v1706_v21, %v1722_v23 }
 0x4e1   : > { %v1731_v30 = vrot.slane %v1723_v25, %v3086_v44  ;;  %v1738_v31 = vrot.slane %v1724_v27, %v3086_v44  ;;  %v1747_v32 = vrot.slane %v1739_v28, %v3086_v44  ;;  %v1754_v33 = vrot.slane %v1740_v29, %v3086_v44  ;;  %v2300_v27 = vld [vmem:[%s3354_s11] ss:$0 sm:$0xff] }
 0x4e3   : > { %v1759_v34 = vcombine.low %v1731_v30, %v1738_v31  ;;  %v2293_v35 = vcombine.high %v1731_v30, %v1738_v31  ;;  %v1775_v36 = vcombine.low %v1747_v32, %v1754_v33  ;;  %v2294_v37 = vcombine.high %v1747_v32, %v1754_v33  ;;  %v2580_v30 = vld [vmem:[%s3357_s14 + $0x30] sm:$0xff]   ;;  %v2581_v31 = vld [vmem:[%s3357_s14 + $0x38] sm:$0xff]   ;;  %v2301_v32 = vld [vmem:[%s3398_s0] ss:$0 sm:$0xff]  ;;  %s2688_s0 = sshll.u32 %s2787_s18, 4  ;;  %s2689_s0 = int_to_ptr.vmem [resolvable:$false] %s2688_s0 }
 0x4e4   : > { %s2690_s30 = scalar_lea.vmem %s2689_s0, 256  ;;  %p2691_p2 = scmp.lt.s32.totalorder %s3297_s15, %s2689_s0 }
 0x4e5   : > { %v1766_v40 = vrot.slane %v1759_v34, %v3084_v38  ;;  %v1774_v41 = vrot.slane %v2293_v35, %v3084_v38  ;;  %v1782_v42 = vrot.slane %v1775_v36, %v3084_v38  ;;  %v1790_v43 = vrot.slane %v2294_v37, %v3084_v38  ;;  %p2692_p3 = scmp.lt.s32.totalorder %s2690_s30, %s2684_s29 }
 0x4e7   : > { %v1792_v45 = vcombine.high %v1766_v40, %v1774_v41  ;;  %v1808_v46 = vcombine.high %v1782_v42, %v1790_v43  ;;  %v1791_v17 = vcombine.low %v1766_v40, %v1774_v41  ;;  %v1807_v47 = vcombine.low %v1782_v42, %v1790_v43  ;;  %p2693_p5 = por %p2692_p3, %p2691_p2 }
 0x4e9   : > { %v1806_v49 = vrot.slane %v1792_v45, %v3086_v44  ;;  %v1822_v50 = vrot.slane %v1808_v46, %v3086_v44  ;;  %v1799_v51 = vrot.slane %v1791_v17, %v3086_v44  ;;  %v1815_v53 = vrot.slane %v1807_v47, %v3086_v44 }
 0x4eb   : > { %v1825_v54 = vcombine.low %v1806_v49, %v1822_v50  ;;  %v1824_v55 = vcombine.high %v1799_v51, %v1815_v53  ;;  %v1826_v56 = vcombine.high %v1806_v49, %v1822_v50  ;;  %v1823_v57 = vcombine.low %v1799_v51, %v1815_v53 }
 0x4ed   : > { %1832 = vrot.lane.b32.xlu1 %v1825_v54, %s2784_s23  ;;  %1828 = vrot.lane.b32.xlu0 %v1824_v55, %s2785_s16  ;;  %s3399_s16 = sld [smem:[#allocation25_spill]] }
 0x4f1   : > { %1836 = vrot.lane.b32.xlu1 %v1826_v56, %s2786_s25  ;;  %s3400_s25 = sld [smem:[#allocation20_spill]] }
 0x4f7   : > { %p3403_p10 = scmp.ne.s32.totalorder %s3400_s25, 0 }
 0x4f9   : > { %p2686_p11 = pnand %p2685_p13, %p3403_p10 }
 0x4fb   : > { %p2687_p0 = pneg %p2686_p11 }
 0x4fd   : > { %p2694_p6 = pnand %p2693_p5, %p2687_p0 }
 0x55f   : > { %v1833_v38 = vpop.permute.xlu1 %1832  ;;  %v1829_v48 = vpop.permute.xlu0 %1828 }
 0x560   : > { %v1839_v52 = vsel %vm1269_vm3, %v1823_v57, %v1829_v48 }
 0x561   : > { %v1841_v59 = vsel %vm1840_vm5, %v1839_v52, %v1833_v38 }
 0x563   : > { %v1837_v58 = vpop.permute.xlu1 %1836 }
 0x564   : > { %v1843_v60 = vsel %vm1842_vm6, %v1841_v59, %v1837_v58 }
 0x565   : > { %v1844_v44 = vpack.c.bf16 %v1843_v60, %v1843_v60 }
 0x567   : > { %2435 = vmatmul.mubr.msk.bf16.vlgmr.msra.gmra.mrb[16].mxu1 %vm629_vm1, %v1844_v44 }
 0x568   : > { %2462 = vmatprep.mubr.msk.bf16.mxu1 %vm2778_vm0, %v2777_v0 }
 0x63a   : > { %v1905_v62 = vpop.f32.mrb[16].mxu1 }
 0x63b   : > { %v1906_v63 = vadd.f32 %v2295_v61, %v1905_v62  ;;  %v2436_v1 = vpop.f32.mrb[17].mxu1 }
 0x63c   : > { %v1908_v2 = vpop.f32.mrb[18].mxu1 }
 0x63d   : > { %v2437_v3 = vpop.f32.mrb[19].mxu1  ;;  %v1911_v4 = vadd.f32 %v1906_v63, %v3051_v8  ;;  %v2574_v8 = vld [vmem:[%s3357_s14] sm:$0xff]  }
 0x63e   : > { %2447 = vmatpush3.bf16.msra.mxu1 %v2574_v8 }
 0x63f   : > { %v1912_v5 = vsel %vm629_vm1, %v1911_v4, 0.0  ;;  %2448 = vmatprep.subr.bf16.mxu1 %v2777_v0 }
 0x640   : > { %1913 = vadd.xlane.f32.xlu0 %v1912_v5 }
 0x642   : > { %2449 = vmatpush3.bf16.msra.mxu1 %v2575_v14 }
 0x643   : > { %2450 = vmatprep.subr.bf16.mxu1 %v2777_v0 }
 0x646   : > { %2451 = vmatpush3.bf16.msra.mxu1 %v2576_v15 }
 0x647   : > { %2452 = vmatprep.subr.bf16.mxu1 %v2777_v0 }
 0x64a   : > { %2453 = vmatpush3.bf16.msra.mxu1 %v2577_v16 }
 0x64b   : > { %2454 = vmatprep.subr.bf16.mxu1 %v2777_v0 }
 0x64e   : > { %2455 = vmatpush3.bf16.msra.mxu1 %v2578_v18 }
 0x64f   : > { %2456 = vmatprep.subr.bf16.mxu1 %v2777_v0 }
 0x652   : > { %2457 = vmatpush3.bf16.msra.mxu1 %v2579_v19 }
 0x653   : > { %2458 = vmatprep.subr.bf16.mxu1 %v2777_v0 }
 0x656   : > { %2459 = vmatpush3.bf16.msra.mxu1 %v2580_v30 }
 0x657   : > { %2460 = vmatprep.subr.bf16.mxu1 %v2777_v0  ;;  %v2305_v0 = vld [vmem:[%s3399_s16] ss:$0 sm:$0xff] }
 0x65a   : > { %2461 = vmatpush3.bf16.msra.mxu1 %v2581_v31 }
 0x6cd   : > { %v1914_v6 = vpop.xlane.xlu0 %1913 }
 0x6ce   : > { %v1916_v7 = vmul.f32 0.03125, %v1914_v6 }
 0x6d0   : > { %v1917_v9 = vsub.f32 %v1911_v4, %v1916_v7 }
 0x6d2   : > { %v1918_v10 = vmul.f32 %v1917_v9, %v1917_v9 }
 0x6d4   : > { %v1919_v11 = vsel %vm629_vm1, %v1918_v10, 0.0 }
 0x6d5   : > { %1920 = vadd.xlane.f32.xlu1 %v1919_v11 }
 0x762   : > { %v1921_v20 = vpop.xlane.xlu1 %1920 }
 0x763   : > { %v1922_v21 = vmul.f32 0.03125, %v1921_v20 }
 0x765   : > { %v1923_v22 = vadd.f32 1e-05, %v1922_v21 }
 0x767   : > { %2598 = vrsqrt.f32 %v1923_v22 }
 0x771   : > { %v2599_v23 = vpop.eup %2598 }
 0x772   : > { %v1925_v25 = vmul.f32 %v2599_v23, %v1917_v9 }
 0x774   : > { %v1933_v28 = vmul.f32 %v2299_v24, %v1925_v25 }
 0x776   : > { %v1941_v29 = vadd.f32 %v2300_v27, %v1933_v28 }
 0x778   : > { %v1942_v26 = vpack.c.bf16 %v1941_v29, %v1941_v29 }
 0x77a   : > { %2443 = vmatmul.mubr.msk.bf16.vlgmr.msra.gmra.mrb[28].mxu0 %vm629_vm1, %v1942_v26 }
 0x84d   : > { %v2003_v33 = vpop.f32.mrb[28].mxu0 }
 0x84e   : > { %v2004_v34 = vadd.f32 %v2301_v32, %v2003_v33  ;;  %v2444_v35 = vpop.f32.mrb[29].mxu0 }
 0x84f   : > { %v2006_v36 = vpop.f32.mrb[30].mxu0 }
 0x850   : > { %v2009_v37 = vmax.f32 %v2004_v34, 0.0  ;;  %v2445_v39 = vpop.f32.mrb[31].mxu0 }
 0x852   : > { %v2010_v40 = vpack.c.bf16 %v2009_v37, %v2009_v37 }
 0x854   : > { %2463 = vmatmul.mubr.bf16.vlgmr.msra.gmra.mrb[20].mxu1 %v2010_v40 }
 0x927   : > { %v2116_v41 = vpop.f32.mrb[20].mxu1 }
 0x928   : > { %v2117_v42 = vadd.f32 %v2305_v0, %v2116_v41  ;;  %v2464_v43 = vpop.f32.mrb[21].mxu1 }
 0x929   : > { %v2119_v45 = vpop.f32.mrb[22].mxu1 }
 0x92a   : > { %v2122_v46 = vadd.f32 %v2117_v42, %v1941_v29  ;;  %v2465_v17 = vpop.f32.mrb[23].mxu1 }
 0x92c   : > { %2123 = vst.msk [vmem:[%s587_s13] sm:$0xff] %vm629_vm1, %v2122_v46 }
 0x92d   : > { %2697 = shalt.err (!%p2694_p6)
}
 0x92e   : > { %s2698_s19 = scalar_lea.hbm %s3295_s26, 128  ;;  %s2702_s16 = scalar_lea.hbm %s3402_s20, 256 }
 0x92f   : > { %p2699_p7 = scmp.ne.s32.totalorder %s3295_s26, %s2698_s19  ;;  %p2703_p4 = scmp.lt.u32.totalorder %s3295_s26, %s3402_s20 }
 0x930   : > { %p2704_p8 = scmp.lt.u32.totalorder %s2702_s16, %s2698_s19  ;;  %p2706_p13 = scmp.lt.u32.totalorder %s2698_s19, %s3295_s26 }
 0x931   : > { %p2700_p9 = pnand %p2699_p7, %p3403_p10 }
 0x932   : > { %p2705_p1 = por %p2704_p8, %p2703_p4 }
 0x933   : > { %p2701_p12 = pneg %p2700_p9 }
 0x934   : > { %p2707_p11 = por %p2706_p13, %p2705_p1 }
 0x936   : > { %p2708_p0 = pnand %p2707_p11, %p2701_p12 }
 0x938   : > { %2711 = shalt.err (!%p2708_p0)
}
 0x939   : > { %2478 = dma.vmem_to_hbm [thread:$0]  (%p3403_p10), %s3297_s15, 128, %s3295_s26, %s2125_s24  }
 0x93a PF: > { %s3404_s28 = sld [smem:[#allocation18_spill]]  ;;  %s3405_s21 = sld [smem:[#allocation14_spill]] }
 0x93b   : > { %s3406_s22 = sld [smem:[#allocation21_spill]] }
 0x940   : > { %p2500_p2 = scmp.ge.s32.totalorder %s3404_s28, 2  ;;  %s2151_s29 = sand.u32 1, %s3405_s21  }
 0x941   : > { %p3407_p3 = scmp.ne.s32.totalorder %s3406_s22, 0  ;;  %s2152_s18 = scalar_lea.sflag [#allocation6], %s2151_s29 }
 0x943   : > { %p2491_p5 = pnand %p2500_p2, %p3407_p3 }
 0x945   : > { %2745 = dma.done.wait (!%p2491_p5), %s2152_s18, 128  }
 0x946   : > { %2747 = vsyncadd (!%p2491_p5), %s2152_s18, 4294967168  ;;  %s31_s26 = sadd.s32 1, %s3404_s28   ;;  %s3408_s21 = sld [smem:[#allocation15_spill]] }
 0x947   : > { %p28_p6 = scmp.ge.s32.totalorder %s31_s26, 4   ;;  %s3409_s22 = sld [smem:[#allocation16_spill]] }
 0x948   : > { %s3410_s23 = sld [smem:[#allocation22_spill]]  ;;  %s3411_s24 = sld [smem:[#allocation17_spill]] }
 0x949   : > { %s3412_s25 = sld [smem:[#allocation19_spill]]  ;;  %30 = sbr.rel (!%p28_p6) target bundleno = 11 (0xb), region = 139 }
 0x950   :  { %2157 = vsyncpa [#allocation5], 1 }
 0x951   :  { %2159 = vsyncpa [#allocation5 + $0x1], 1 }
 0x952   :  { %2160 = vsyncpa [#allocation8], 1 }
 0x953   :  { %2161 = vsyncpa [#allocation6], 1 }
 0x954   :  { %2163 = vsyncpa [#allocation6 + $0x1], 1 }

</bundles_post_ra>
